<compile_context>
chip_gen: v7x
topology: tpu7x:2x2x1
jax: 0.10.0
libtpu: 0.0.40
codegen_flags: <defaults>
</compile_context>

<pallas_src>
import functools
import math

import jax
import jax.numpy as jnp
from jax.experimental import pallas as pl
from jax.experimental.pallas import tpu as pltpu

EPS = 1e-5
NEG_INF = -1e30


def _tpu_config():
    """Generation-aware VMEM limit and tile targets."""
    vmem = 64 * 1024 * 1024
    try:
        info = pltpu.get_tpu_info()
        vmem = int(getattr(info, "vmem_capacity_bytes", vmem) or vmem)
    except Exception:
        pass
    if vmem >= 96 * 1024 * 1024:
        # v5e / v6e class: 128 MiB physical VMEM -> big row tiles, high limit.
        return {"vmem_limit": 100 * 1024 * 1024, "tm": 768, "tn": 512, "tf": 512, "tq": 512}
    # v7x class: 64 MiB physical VMEM -> smaller tiles, conservative limit.
    return {"vmem_limit": 48 * 1024 * 1024, "tm": 256, "tn": 512, "tf": 256, "tq": 256}


_CFG = _tpu_config()
VMEM_LIMIT = _CFG["vmem_limit"]


def _tile(n, target, mult):
    """Largest tile <= target that is a multiple of `mult` and divides n; else full n.

    Weight-like dims (vocab, d_ff, d_model) are padded/asserted to multiples of 128
    elsewhere so the full-dimension fallback can only hit row dims (perf-only)."""
    if n <= target:
        return n
    t = (target // mult) * mult
    while t >= mult:
        if n % t == 0:
            return t
        t -= mult
    return n


# ----------------------------- Pallas kernels -----------------------------

def rmsnorm_matmul_kernel(x_ref, g_ref, w_ref, o_ref, xn_sc):
    # o[i, j] = RMSNorm(x[i]) @ W[:, j]; normalized bf16 activations cached at j == 0.
    @pl.when(pl.program_id(1) == 0)
    def _norm():
        x = x_ref[...].astype(jnp.float32)
        ms = jnp.mean(x * x, axis=-1, keepdims=True)
        xn = x * jax.lax.rsqrt(ms + EPS) * g_ref[...]
        xn_sc[...] = xn.astype(jnp.bfloat16)

    o_ref[...] = jnp.dot(xn_sc[...], w_ref[...],
                         preferred_element_type=jnp.float32).astype(o_ref.dtype)


def flash_attn_kernel(q_ref, k_ref, v_ref, o_ref, m_sc, l_sc, acc_sc, *, num_heads, block):
    # Fused multi-head causal flash attention over a (B, S, 3*D) QKV buffer.
    # q_ref: (tq, D) bf16, k_ref/v_ref: (tk, D) bf16 (tq == tk == block).
    # Heads are an in-kernel loop; online-softmax stats are per-head scratches.
    qi = pl.program_id(1)
    ki = pl.program_id(2)
    Hd = q_ref.shape[-1] // num_heads

    @pl.when(ki == 0)
    def _init():
        m_sc[...] = jnp.full(m_sc.shape, NEG_INF, m_sc.dtype)
        l_sc[...] = jnp.zeros(l_sc.shape, l_sc.dtype)
        acc_sc[...] = jnp.zeros(acc_sc.shape, acc_sc.dtype)

    # Fully-future kv tiles (ki > qi) are skipped; their DMA is also avoided by
    # the clamped kv index_map in the wrapper.
    @pl.when(ki <= qi)
    def _compute():
        # Causal mask is shared across heads -> hoisted out of the head loop.
        row = jax.lax.broadcasted_iota(jnp.int32, (block, block), 0) + qi * block
        col = jax.lax.broadcasted_iota(jnp.int32, (block, block), 1) + ki * block
        mask = col <= row

        for h in range(num_heads):
            hs = slice(h * Hd, (h + 1) * Hd)
            q = q_ref[:, hs]                      # bf16; 1/sqrt(Hd) folded into Wq
            k = k_ref[:, hs]
            v = v_ref[:, hs]

            s = jax.lax.dot_general(q, k, (((1,), (1,)), ((), ())),
                                    preferred_element_type=jnp.float32)
            s = jnp.where(mask, s, NEG_INF)

            m_prev = m_sc[h]
            m_new = jnp.maximum(m_prev, jnp.max(s, axis=-1, keepdims=True))
            alpha = jnp.exp(m_prev - m_new)
            p = jnp.exp(s - m_new)
            l_sc[h] = alpha * l_sc[h] + jnp.sum(p, axis=-1, keepdims=True)
            acc_sc[:, hs] = alpha * acc_sc[:, hs] + jnp.dot(
                p.astype(jnp.bfloat16), v, preferred_element_type=jnp.float32)
            m_sc[h] = m_new

    @pl.when(ki == pl.num_programs(2) - 1)
    def _finalize():
        for h in range(num_heads):
            hs = slice(h * Hd, (h + 1) * Hd)
            inv_l = pl.reciprocal(l_sc[h], approx=False)
            o_ref[:, hs] = (acc_sc[:, hs] * inv_l).astype(o_ref.dtype)


def matmul_residual_kernel(x_ref, w_ref, r_ref, o_ref):
    # o[i, j] = r[i, j] + x[i] @ W[:, j]   (x bf16, W bf16, r/o f32)
    y = jnp.dot(x_ref[...].astype(jnp.bfloat16), w_ref[...],
                preferred_element_type=jnp.float32)
    o_ref[...] = r_ref[...] + y


def rmsnorm_swiglu_kernel(x_ref, g_ref, w1_ref, w3_ref, w2_ref, o_ref, xn_sc):
    # Fused: o = x + SwiGLU(RMSNorm(x)), d_ff tiled along grid axis 1 ("arbitrary").
    # Accumulate directly into the resident f32 output block (no acc scratch).
    j = pl.program_id(1)

    @pl.when(j == 0)
    def _init():
        x = x_ref[...].astype(jnp.float32)
        ms = jnp.mean(x * x, axis=-1, keepdims=True)
        xn = x * jax.lax.rsqrt(ms + EPS) * g_ref[...]
        xn_sc[...] = xn.astype(jnp.bfloat16)
        o_ref[...] = x                              # residual folded into the output

    xn = xn_sc[...]
    a = jnp.dot(xn, w1_ref[...], preferred_element_type=jnp.float32)   # (tm, tf)
    b = jnp.dot(xn, w3_ref[...], preferred_element_type=jnp.float32)
    h = (a * jax.nn.sigmoid(a) * b).astype(jnp.bfloat16)               # SiLU(a) * b
    o_ref[...] = o_ref[...] + jnp.dot(h, w2_ref[...],
                                      preferred_element_type=jnp.float32)


# ----------------------------- wrappers -----------------------------

def rmsnorm_matmul(x2d, g, w_t, *, out_dtype=jnp.float32,
                   tm_target=_CFG["tm"], tn_target=_CFG["tn"]):
    """(RMSNorm(x) @ W) with W pre-transposed to (D, N_out) bf16."""
    N, D = x2d.shape
    Nout = w_t.shape[1]
    tm = _tile(N, tm_target, 8)
    tn = _tile(Nout, tn_target, 128)
    grid = (N // tm, Nout // tn)
    return pl.pallas_call(
        rmsnorm_matmul_kernel,
        out_shape=jax.ShapeDtypeStruct((N, Nout), out_dtype),
        grid=grid,
        in_specs=[pl.BlockSpec((tm, D), lambda i, j: (i, 0)),
                  pl.BlockSpec((1, D), lambda i, j: (0, 0)),
                  pl.BlockSpec((D, tn), lambda i, j: (0, j))],
        out_specs=pl.BlockSpec((tm, tn), lambda i, j: (i, j)),
        scratch_shapes=[pltpu.VMEM((tm, D), jnp.bfloat16)],
        compiler_params=pltpu.CompilerParams(
            dimension_semantics=("parallel", "arbitrary"),
            vmem_limit_bytes=VMEM_LIMIT),
    )(x2d, g.reshape(1, D), w_t)


def flash_attention(qkv, num_heads, *, out_dtype=jnp.bfloat16, t_target=_CFG["tq"]):
    """Causal multi-head flash attention.

    qkv: (B, S, 3*D) bf16 laid out as [q | k | v] along the last dim, each D wide
    with head h occupying columns [h*Hd, (h+1)*Hd). Returns (B, S, D) in `out_dtype`
    with heads already concatenated (no XLA transposes needed)."""
    B, S, threeD = qkv.shape
    D = threeD // 3
    assert D % num_heads == 0
    t = _tile(S, t_target, 8)
    n = S // t
    grid = (B, n, n)
    kern = functools.partial(flash_attn_kernel, num_heads=num_heads, block=t)

    q_spec = pl.BlockSpec((None, t, D), lambda b, qi, ki: (b, qi, 0))
    # Clamp the kv block index at the causal diagonal: future tiles reuse the
    # already-fetched block (no wasted DMA); their compute is skipped in-kernel.
    k_spec = pl.BlockSpec((None, t, D), lambda b, qi, ki: (b, jnp.minimum(ki, qi), 1))
    v_spec = pl.BlockSpec((None, t, D), lambda b, qi, ki: (b, jnp.minimum(ki, qi), 2))
    o_spec = pl.BlockSpec((None, t, D), lambda b, qi, ki: (b, qi, 0))

    return pl.pallas_call(
        kern,
        out_shape=jax.ShapeDtypeStruct((B, S, D), out_dtype),
        grid=grid,
        in_specs=[q_spec, k_spec, v_spec],
        out_specs=o_spec,
        scratch_shapes=[pltpu.VMEM((num_heads, t, 1), jnp.float32),
                        pltpu.VMEM((num_heads, t, 1), jnp.float32),
                        pltpu.VMEM((t, D), jnp.float32)],
        compiler_params=pltpu.CompilerParams(
            dimension_semantics=("parallel", "parallel", "arbitrary"),
            vmem_limit_bytes=VMEM_LIMIT),
    )(qkv, qkv, qkv)


def matmul_residual(x2d, w_t, r2d, *, tm_target=_CFG["tm"], tn_target=_CFG["tn"]):
    """r + x @ W with W pre-transposed (D, D) bf16. Tiled over rows AND output columns."""
    N, D = x2d.shape
    Dout = w_t.shape[1]
    tm = _tile(N, tm_target, 8)
    tn = _tile(Dout, tn_target, 128)
    grid = (N // tm, Dout // tn)
    return pl.pallas_call(
        matmul_residual_kernel,
        out_shape=jax.ShapeDtypeStruct((N, Dout), jnp.float32),
        grid=grid,
        in_specs=[pl.BlockSpec((tm, D), lambda i, j: (i, 0)),
                  pl.BlockSpec((D, tn), lambda i, j: (0, j)),
                  pl.BlockSpec((tm, tn), lambda i, j: (i, j))],
        out_specs=pl.BlockSpec((tm, tn), lambda i, j: (i, j)),
        compiler_params=pltpu.CompilerParams(
            dimension_semantics=("parallel", "parallel"),
            vmem_limit_bytes=VMEM_LIMIT),
    )(x2d, w_t, r2d)


def rmsnorm_swiglu(x2d, g, w1_t, w3_t, w2_t, *, tm_target=_CFG["tm"], tf_target=_CFG["tf"]):
    """x + SwiGLU(RMSNorm(x)). Grid over (row tiles, d_ff tiles); d_ff is the reduction axis."""
    N, D = x2d.shape
    d_ff = w1_t.shape[1]
    tm = _tile(N, tm_target, 8)
    tf = _tile(d_ff, tf_target, 128)
    grid = (N // tm, d_ff // tf)
    return pl.pallas_call(
        rmsnorm_swiglu_kernel,
        out_shape=jax.ShapeDtypeStruct((N, D), jnp.float32),
        grid=grid,
        in_specs=[pl.BlockSpec((tm, D), lambda i, j: (i, 0)),
                  pl.BlockSpec((1, D), lambda i, j: (0, 0)),
                  pl.BlockSpec((D, tf), lambda i, j: (0, j)),
                  pl.BlockSpec((D, tf), lambda i, j: (0, j)),
                  pl.BlockSpec((tf, D), lambda i, j: (j, 0))],
        out_specs=pl.BlockSpec((tm, D), lambda i, j: (i, 0)),
        scratch_shapes=[pltpu.VMEM((tm, D), jnp.bfloat16)],
        compiler_params=pltpu.CompilerParams(
            dimension_semantics=("parallel", "arbitrary"),
            vmem_limit_bytes=VMEM_LIMIT),
    )(x2d, g.reshape(1, D), w1_t, w3_t, w2_t)


# ----------------------------- model -----------------------------

def init_params(key, vocab_size, num_layers, d_model, d_ff):
    """PyTorch-style (out_features, in_features) f32 parameters."""
    def nrm(k, shape, scale=0.02):
        return (scale * jax.random.normal(k, shape)).astype(jnp.float32)

    keys = jax.random.split(key, 2 + num_layers)
    params = {
        "embedding": nrm(keys[0], (vocab_size, d_model), 1.0),
        "final_norm_w": jnp.ones((d_model,), jnp.float32),
        "lm_head": nrm(keys[1], (vocab_size, d_model)),
        "blocks": [],
    }
    for li in range(num_layers):
        bk = jax.random.split(keys[2 + li], 7)
        params["blocks"].append({
            "norm1_w": jnp.ones((d_model,), jnp.float32),
            "norm2_w": jnp.ones((d_model,), jnp.float32),
            "wq": nrm(bk[0], (d_model, d_model)),
            "wk": nrm(bk[1], (d_model, d_model)),
            "wv": nrm(bk[2], (d_model, d_model)),
            "wo": nrm(bk[3], (d_model, d_model)),
            "w1": nrm(bk[4], (d_ff, d_model)),
            "w2": nrm(bk[5], (d_model, d_ff)),
            "w3": nrm(bk[6], (d_ff, d_model)),
        })
    return params


def prepare_params(params, num_heads):
    """One-time host-side prep: transpose to (in, out), cast matmul weights to bf16,
    fuse Wq/Wk/Wv into one (D, 3D) projection with 1/sqrt(Hd) folded into Wq,
    and pad the LM head columns to a multiple of 128."""
    V, D = params["lm_head"].shape
    d_ff = params["blocks"][0]["w1"].shape[0]
    assert D % 128 == 0, "d_model must be a multiple of 128 for the fused attention layout"
    assert d_ff % 128 == 0, "d_ff must be a multiple of 128 for VMEM-safe FFN tiling"
    assert D % num_heads == 0
    Hd = D // num_heads
    sm_scale = 1.0 / math.sqrt(Hd)

    lm_t = params["lm_head"].T.astype(jnp.bfloat16)                 # (D, V)
    Vp = ((V + 127) // 128) * 128
    if Vp != V:
        lm_t = jnp.pad(lm_t, ((0, 0), (0, Vp - V)))

    prepped = {
        "embedding": params["embedding"],
        "final_norm_w": params["final_norm_w"],
        "lm_head_t": lm_t,                                           # (D, Vp)
        "blocks": [],
    }
    for blk in params["blocks"]:
        wq_t = blk["wq"].T * sm_scale                                # fold softmax scale
        wqkv_t = jnp.concatenate([wq_t, blk["wk"].T, blk["wv"].T],
                                 axis=1).astype(jnp.bfloat16)        # (D, 3D)
        prepped["blocks"].append({
            "norm1_w": blk["norm1_w"],
            "norm2_w": blk["norm2_w"],
            "wqkv_t": wqkv_t,
            "wo_t": blk["wo"].T.astype(jnp.bfloat16),                # (D, D)
            "w1_t": blk["w1"].T.astype(jnp.bfloat16),                # (D, d_ff)
            "w3_t": blk["w3"].T.astype(jnp.bfloat16),                # (D, d_ff)
            "w2_t": blk["w2"].T.astype(jnp.bfloat16),                # (d_ff, D)
        })
    return prepped


def attention_block(x, norm_w, wqkv_t, wo_t, num_heads):
    """y = x + MHA(RMSNorm(x)): fused norm+QKV (bf16 out), fused flash attention over
    the (B, S, 3D) QKV view (no head transposes), fused out-proj + residual."""
    B, S, D = x.shape
    x2d = x.reshape(B * S, D)

    qkv = rmsnorm_matmul(x2d, norm_w, wqkv_t, out_dtype=jnp.bfloat16)   # (B*S, 3D) bf16
    attn = flash_attention(qkv.reshape(B, S, 3 * D), num_heads)         # (B, S, D) bf16
    y2d = matmul_residual(attn.reshape(B * S, D), wo_t, x2d)            # (B*S, D) f32
    return y2d.reshape(B, S, D)


def transformer_lm(ids, params, num_heads):
    h = jnp.take(params["embedding"], ids, axis=0).astype(jnp.float32)  # (B, S, D)
    B, S, D = h.shape

    for blk in params["blocks"]:
        h = attention_block(h, blk["norm1_w"], blk["wqkv_t"], blk["wo_t"], num_heads)
        h = rmsnorm_swiglu(h.reshape(B * S, D), blk["norm2_w"],
                           blk["w1_t"], blk["w3_t"], blk["w2_t"]).reshape(B, S, D)

    logits = rmsnorm_matmul(h.reshape(B * S, D), params["final_norm_w"],
                            params["lm_head_t"], out_dtype=jnp.float32)  # (B*S, Vp)
    V = params["embedding"].shape[0]
    return logits[:, :V].reshape(B, S, V)


# TODO(synk): rope=None in the reference constructor, so RoPE is intentionally not applied.

if __name__ == "__main__":
    vocab_size = 256
    context_length = 16
    num_layers = 2
    d_model = 128
    d_ff = 256
    num_heads = 4
    B, S = 2, context_length

    key = jax.random.PRNGKey(0)
    pkey, ikey = jax.random.split(key)
    params = prepare_params(init_params(pkey, vocab_size, num_layers, d_model, d_ff),
                            num_heads)
    ids = jax.random.randint(ikey, (B, S), 0, vocab_size, dtype=jnp.int32)

    fwd = jax.jit(transformer_lm, static_argnums=(2,))
    logits = fwd(ids, params, num_heads)
    jax.block_until_ready(logits)
    assert logits.shape == (B, S, vocab_size), logits.shape
    assert logits.dtype == jnp.float32
    print("KERNEL_OK")
</pallas_src>

<mosaic_0001>
module attributes {stable_mosaic.version = 11 : i64} {
  func.func @rmsnorm_matmul_kernel(%arg0: i32, %arg1: i32, %arg2: memref<32x128xf32, #tpu.memory_space<vmem>>, %arg3: memref<1x128xf32, #tpu.memory_space<vmem>>, %arg4: memref<128x384xbf16, #tpu.memory_space<vmem>>, %arg5: memref<32x384xbf16, #tpu.memory_space<vmem>>, %arg6: memref<32x128xbf16, #tpu.memory_space<vmem>>) attributes {dimension_semantics = [#tpu.dimension_semantics<parallel>, #tpu.dimension_semantics<arbitrary>], iteration_bounds = array<i64: 1, 1>, scalar_prefetch = 0 : i64, scratch_operands = 1 : i64, tpu.core_type = #tpu.core_type<tc>, window_params = [{transform_indices = @transform_0, window_bounds = array<i64: 32, 128>}, {pipeline_mode = #tpu.pipeline_mode<synchronous>, transform_indices = @transform_1, window_bounds = array<i64: 1, 128>}, {transform_indices = @transform_2, window_bounds = array<i64: 128, 384>}, {transform_indices = @transform_3, window_bounds = array<i64: 32, 384>}]} {
    %c0_i32 = arith.constant 0 : i32
    %0 = arith.cmpi eq, %arg1, %c0_i32 : i32
    %1 = arith.extui %0 : i1 to i32
    %c0_i32_0 = arith.constant 0 : i32
    %2 = arith.cmpi ne, %1, %c0_i32_0 : i32
    scf.if %2 {
      %c0_6 = arith.constant 0 : index
      %c0_7 = arith.constant 0 : index
      %8 = vector.load %arg2[%c0_6, %c0_7] : memref<32x128xf32, #tpu.memory_space<vmem>>, vector<32x128xf32>
      %9 = arith.mulf %8, %8 : vector<32x128xf32>
      %cst_8 = arith.constant dense<0.000000e+00> : vector<32xf32>
      %10 = vector.multi_reduction <add>, %9, %cst_8 [1] : vector<32x128xf32> to vector<32xf32>
      %11 = vector.shape_cast %10 : vector<32xf32> to vector<32x1xf32>
      %cst_9 = arith.constant 1.280000e+02 : f32
      %12 = vector.broadcast %cst_9 : f32 to vector<32x1xf32>
      %13 = arith.divf %11, %12 : vector<32x1xf32>
      %cst_10 = arith.constant 9.99999974E-6 : f32
      %14 = vector.broadcast %cst_10 : f32 to vector<32x1xf32>
      %15 = arith.addf %13, %14 : vector<32x1xf32>
      %16 = math.rsqrt %15 : vector<32x1xf32>
      %17 = vector.broadcast %16 : vector<32x1xf32> to vector<32x128xf32>
      %18 = arith.mulf %8, %17 : vector<32x128xf32>
      %c0_11 = arith.constant 0 : index
      %c0_12 = arith.constant 0 : index
      %19 = vector.load %arg3[%c0_11, %c0_12] : memref<1x128xf32, #tpu.memory_space<vmem>>, vector<1x128xf32>
      %20 = vector.broadcast %19 : vector<1x128xf32> to vector<32x128xf32>
      %21 = arith.mulf %18, %20 : vector<32x128xf32>
      %22 = arith.truncf %21 : vector<32x128xf32> to vector<32x128xbf16>
      %c0_13 = arith.constant 0 : index
      %c0_14 = arith.constant 0 : index
      %23 = vector.load %arg6[%c0_13, %c0_14] : memref<32x128xbf16, #tpu.memory_space<vmem>>, vector<32x128xbf16>
      tpu.vector_store %arg6[%c0_13, %c0_14], %22 {strides = array<i32>} : memref<32x128xbf16, #tpu.memory_space<vmem>>, vector<32x128xbf16>,
    } else {
    }
    %c0 = arith.constant 0 : index
    %c0_1 = arith.constant 0 : index
    %3 = vector.load %arg6[%c0, %c0_1] : memref<32x128xbf16, #tpu.memory_space<vmem>>, vector<32x128xbf16>
    %c0_2 = arith.constant 0 : index
    %c0_3 = arith.constant 0 : index
    %4 = vector.load %arg4[%c0_2, %c0_3] : memref<128x384xbf16, #tpu.memory_space<vmem>>, vector<128x384xbf16>
    %cst = arith.constant dense<0.000000e+00> : vector<32x384xf32>
    %5 = tpu.matmul %3, %4, %cst {dimension_numbers = #tpu.dot_dimension_numbers<[1], [0], [0], [1], [0, 0, 1, 1], [], []>} : vector<32x128xbf16>, vector<128x384xbf16>, vector<32x384xf32> -> vector<32x384xf32>
    %6 = arith.truncf %5 : vector<32x384xf32> to vector<32x384xbf16>
    %c0_4 = arith.constant 0 : index
    %c0_5 = arith.constant 0 : index
    %7 = vector.load %arg5[%c0_4, %c0_5] : memref<32x384xbf16, #tpu.memory_space<vmem>>, vector<32x384xbf16>
    tpu.vector_store %arg5[%c0_4, %c0_5], %6 {strides = array<i32>} : memref<32x384xbf16, #tpu.memory_space<vmem>>, vector<32x384xbf16>,
    return
  }
  func.func @transform_0(%arg0: i32, %arg1: i32) -> (i32, i32) {
    %c0_i32 = arith.constant 0 : i32
    %c0_i32_0 = arith.constant 0 : i32
    return %arg0, %c0_i32 : i32, i32
  }
  func.func @transform_1(%arg0: i32, %arg1: i32) -> (i32, i32) {
    %c0_i32 = arith.constant 0 : i32
    %c0_i32_0 = arith.constant 0 : i32
    %c0_i32_1 = arith.constant 0 : i32
    return %c0_i32, %c0_i32_0 : i32, i32
  }
  func.func @transform_2(%arg0: i32, %arg1: i32) -> (i32, i32) {
    %c0_i32 = arith.constant 0 : i32
    %c0_i32_0 = arith.constant 0 : i32
    return %c0_i32, %arg1 : i32, i32
  }
  func.func @transform_3(%arg0: i32, %arg1: i32) -> (i32, i32) {
    %c0_i32 = arith.constant 0 : i32
    return %arg0, %arg1 : i32, i32
  }
}

module attributes {stable_mosaic.version = 11 : i64} {
  func.func @matmul_residual_kernel(%arg0: i32, %arg1: i32, %arg2: memref<32x128xbf16, #tpu.memory_space<vmem>>, %arg3: memref<128x128xbf16, #tpu.memory_space<vmem>>, %arg4: memref<32x128xf32, #tpu.memory_space<vmem>>, %arg5: memref<32x128xf32, #tpu.memory_space<vmem>>) attributes {dimension_semantics = [#tpu.dimension_semantics<parallel>, #tpu.dimension_semantics<parallel>], iteration_bounds = array<i64: 1, 1>, scalar_prefetch = 0 : i64, scratch_operands = 0 : i64, tpu.core_type = #tpu.core_type<tc>, window_params = [{transform_indices = @transform_0, window_bounds = array<i64: 32, 128>}, {transform_indices = @transform_1, window_bounds = array<i64: 128, 128>}, {transform_indices = @transform_2, window_bounds = array<i64: 32, 128>}, {transform_indices = @transform_3, window_bounds = array<i64: 32, 128>}]} {
    %c0 = arith.constant 0 : index
    %c0_0 = arith.constant 0 : index
    %0 = vector.load %arg2[%c0, %c0_0] : memref<32x128xbf16, #tpu.memory_space<vmem>>, vector<32x128xbf16>
    %c0_1 = arith.constant 0 : index
    %c0_2 = arith.constant 0 : index
    %1 = vector.load %arg3[%c0_1, %c0_2] : memref<128x128xbf16, #tpu.memory_space<vmem>>, vector<128x128xbf16>
    %cst = arith.constant dense<0.000000e+00> : vector<32x128xf32>
    %2 = tpu.matmul %0, %1, %cst {dimension_numbers = #tpu.dot_dimension_numbers<[1], [0], [0], [1], [0, 0, 1, 1], [], []>} : vector<32x128xbf16>, vector<128x128xbf16>, vector<32x128xf32> -> vector<32x128xf32>
    %c0_3 = arith.constant 0 : index
    %c0_4 = arith.constant 0 : index
    %3 = vector.load %arg4[%c0_3, %c0_4] : memref<32x128xf32, #tpu.memory_space<vmem>>, vector<32x128xf32>
    %4 = arith.addf %3, %2 : vector<32x128xf32>
    %c0_5 = arith.constant 0 : index
    %c0_6 = arith.constant 0 : index
    %5 = vector.load %arg5[%c0_5, %c0_6] : memref<32x128xf32, #tpu.memory_space<vmem>>, vector<32x128xf32>
    tpu.vector_store %arg5[%c0_5, %c0_6], %4 {strides = array<i32>} : memref<32x128xf32, #tpu.memory_space<vmem>>, vector<32x128xf32>,
    return
  }
  func.func @transform_0(%arg0: i32, %arg1: i32) -> (i32, i32) {
    %c0_i32 = arith.constant 0 : i32
    %c0_i32_0 = arith.constant 0 : i32
    return %arg0, %c0_i32 : i32, i32
  }
  func.func @transform_1(%arg0: i32, %arg1: i32) -> (i32, i32) {
    %c0_i32 = arith.constant 0 : i32
    %c0_i32_0 = arith.constant 0 : i32
    return %c0_i32, %arg1 : i32, i32
  }
  func.func @transform_2(%arg0: i32, %arg1: i32) -> (i32, i32) {
    %c0_i32 = arith.constant 0 : i32
    return %arg0, %arg1 : i32, i32
  }
  func.func @transform_3(%arg0: i32, %arg1: i32) -> (i32, i32) {
    %c0_i32 = arith.constant 0 : i32
    return %arg0, %arg1 : i32, i32
  }
}

module attributes {stable_mosaic.version = 11 : i64} {
  func.func @rmsnorm_swiglu_kernel(%arg0: i32, %arg1: i32, %arg2: memref<32x128xf32, #tpu.memory_space<vmem>>, %arg3: memref<1x128xf32, #tpu.memory_space<vmem>>, %arg4: memref<128x256xbf16, #tpu.memory_space<vmem>>, %arg5: memref<128x256xbf16, #tpu.memory_space<vmem>>, %arg6: memref<256x128xbf16, #tpu.memory_space<vmem>>, %arg7: memref<32x128xf32, #tpu.memory_space<vmem>>, %arg8: memref<32x128xbf16, #tpu.memory_space<vmem>>) attributes {dimension_semantics = [#tpu.dimension_semantics<parallel>, #tpu.dimension_semantics<arbitrary>], iteration_bounds = array<i64: 1, 1>, scalar_prefetch = 0 : i64, scratch_operands = 1 : i64, tpu.core_type = #tpu.core_type<tc>, window_params = [{transform_indices = @transform_0, window_bounds = array<i64: 32, 128>}, {pipeline_mode = #tpu.pipeline_mode<synchronous>, transform_indices = @transform_1, window_bounds = array<i64: 1, 128>}, {transform_indices = @transform_2, window_bounds = array<i64: 128, 256>}, {transform_indices = @transform_3, window_bounds = array<i64: 128, 256>}, {transform_indices = @transform_4, window_bounds = array<i64: 256, 128>}, {transform_indices = @transform_5, window_bounds = array<i64: 32, 128>}]} {
    %c0_i32 = arith.constant 0 : i32
    %0 = arith.cmpi eq, %arg1, %c0_i32 : i32
    %1 = arith.extui %0 : i1 to i32
    %c0_i32_0 = arith.constant 0 : i32
    %2 = arith.cmpi ne, %1, %c0_i32_0 : i32
    scf.if %2 {
      %c0_15 = arith.constant 0 : index
      %c0_16 = arith.constant 0 : index
      %21 = vector.load %arg2[%c0_15, %c0_16] : memref<32x128xf32, #tpu.memory_space<vmem>>, vector<32x128xf32>
      %22 = arith.mulf %21, %21 : vector<32x128xf32>
      %cst_17 = arith.constant dense<0.000000e+00> : vector<32xf32>
      %23 = vector.multi_reduction <add>, %22, %cst_17 [1] : vector<32x128xf32> to vector<32xf32>
      %24 = vector.shape_cast %23 : vector<32xf32> to vector<32x1xf32>
      %cst_18 = arith.constant 1.280000e+02 : f32
      %25 = vector.broadcast %cst_18 : f32 to vector<32x1xf32>
      %26 = arith.divf %24, %25 : vector<32x1xf32>
      %cst_19 = arith.constant 9.99999974E-6 : f32
      %27 = vector.broadcast %cst_19 : f32 to vector<32x1xf32>
      %28 = arith.addf %26, %27 : vector<32x1xf32>
      %29 = math.rsqrt %28 : vector<32x1xf32>
      %30 = vector.broadcast %29 : vector<32x1xf32> to vector<32x128xf32>
      %31 = arith.mulf %21, %30 : vector<32x128xf32>
      %c0_20 = arith.constant 0 : index
      %c0_21 = arith.constant 0 : index
      %32 = vector.load %arg3[%c0_20, %c0_21] : memref<1x128xf32, #tpu.memory_space<vmem>>, vector<1x128xf32>
      %33 = vector.broadcast %32 : vector<1x128xf32> to vector<32x128xf32>
      %34 = arith.mulf %31, %33 : vector<32x128xf32>
      %35 = arith.truncf %34 : vector<32x128xf32> to vector<32x128xbf16>
      %c0_22 = arith.constant 0 : index
      %c0_23 = arith.constant 0 : index
      %36 = vector.load %arg8[%c0_22, %c0_23] : memref<32x128xbf16, #tpu.memory_space<vmem>>, vector<32x128xbf16>
      tpu.vector_store %arg8[%c0_22, %c0_23], %35 {strides = array<i32>} : memref<32x128xbf16, #tpu.memory_space<vmem>>, vector<32x128xbf16>,
      %c0_24 = arith.constant 0 : index
      %c0_25 = arith.constant 0 : index
      %37 = vector.load %arg7[%c0_24, %c0_25] : memref<32x128xf32, #tpu.memory_space<vmem>>, vector<32x128xf32>
      tpu.vector_store %arg7[%c0_24, %c0_25], %21 {strides = array<i32>} : memref<32x128xf32, #tpu.memory_space<vmem>>, vector<32x128xf32>,
    } else {
    }
    %c0 = arith.constant 0 : index
    %c0_1 = arith.constant 0 : index
    %3 = vector.load %arg8[%c0, %c0_1] : memref<32x128xbf16, #tpu.memory_space<vmem>>, vector<32x128xbf16>
    %c0_2 = arith.constant 0 : index
    %c0_3 = arith.constant 0 : index
    %4 = vector.load %arg4[%c0_2, %c0_3] : memref<128x256xbf16, #tpu.memory_space<vmem>>, vector<128x256xbf16>
    %cst = arith.constant dense<0.000000e+00> : vector<32x256xf32>
    %5 = tpu.matmul %3, %4, %cst {dimension_numbers = #tpu.dot_dimension_numbers<[1], [0], [0], [1], [0, 0, 1, 1], [], []>} : vector<32x128xbf16>, vector<128x256xbf16>, vector<32x256xf32> -> vector<32x256xf32>
    %c0_4 = arith.constant 0 : index
    %c0_5 = arith.constant 0 : index
    %6 = vector.load %arg5[%c0_4, %c0_5] : memref<128x256xbf16, #tpu.memory_space<vmem>>, vector<128x256xbf16>
    %cst_6 = arith.constant dense<0.000000e+00> : vector<32x256xf32>
    %7 = tpu.matmul %3, %6, %cst_6 {dimension_numbers = #tpu.dot_dimension_numbers<[1], [0], [0], [1], [0, 0, 1, 1], [], []>} : vector<32x128xbf16>, vector<128x256xbf16>, vector<32x256xf32> -> vector<32x256xf32>
    %8 = arith.negf %5 : vector<32x256xf32>
    %9 = math.exp %8 : vector<32x256xf32>
    %cst_7 = arith.constant 1.000000e+00 : f32
    %10 = vector.broadcast %cst_7 : f32 to vector<32x256xf32>
    %11 = arith.addf %10, %9 : vector<32x256xf32>
    %12 = arith.divf %10, %11 : vector<32x256xf32>
    %13 = arith.mulf %5, %12 : vector<32x256xf32>
    %14 = arith.mulf %13, %7 : vector<32x256xf32>
    %15 = arith.truncf %14 : vector<32x256xf32> to vector<32x256xbf16>
    %c0_8 = arith.constant 0 : index
    %c0_9 = arith.constant 0 : index
    %16 = vector.load %arg7[%c0_8, %c0_9] : memref<32x128xf32, #tpu.memory_space<vmem>>, vector<32x128xf32>
    %c0_10 = arith.constant 0 : index
    %c0_11 = arith.constant 0 : index
    %17 = vector.load %arg6[%c0_10, %c0_11] : memref<256x128xbf16, #tpu.memory_space<vmem>>, vector<256x128xbf16>
    %cst_12 = arith.constant dense<0.000000e+00> : vector<32x128xf32>
    %18 = tpu.matmul %15, %17, %cst_12 {dimension_numbers = #tpu.dot_dimension_numbers<[1], [0], [0], [1], [0, 0, 1, 1], [], []>} : vector<32x256xbf16>, vector<256x128xbf16>, vector<32x128xf32> -> vector<32x128xf32>
    %19 = arith.addf %16, %18 : vector<32x128xf32>
    %c0_13 = arith.constant 0 : index
    %c0_14 = arith.constant 0 : index
    %20 = vector.load %arg7[%c0_13, %c0_14] : memref<32x128xf32, #tpu.memory_space<vmem>>, vector<32x128xf32>
    tpu.vector_store %arg7[%c0_13, %c0_14], %19 {strides = array<i32>} : memref<32x128xf32, #tpu.memory_space<vmem>>, vector<32x128xf32>,
    return
  }
  func.func @transform_0(%arg0: i32, %arg1: i32) -> (i32, i32) {
    %c0_i32 = arith.constant 0 : i32
    %c0_i32_0 = arith.constant 0 : i32
    return %arg0, %c0_i32 : i32, i32
  }
  func.func @transform_1(%arg0: i32, %arg1: i32) -> (i32, i32) {
    %c0_i32 = arith.constant 0 : i32
    %c0_i32_0 = arith.constant 0 : i32
    %c0_i32_1 = arith.constant 0 : i32
    return %c0_i32, %c0_i32_0 : i32, i32
  }
  func.func @transform_2(%arg0: i32, %arg1: i32) -> (i32, i32) {
    %c0_i32 = arith.constant 0 : i32
    %c0_i32_0 = arith.constant 0 : i32
    return %c0_i32, %arg1 : i32, i32
  }
  func.func @transform_3(%arg0: i32, %arg1: i32) -> (i32, i32) {
    %c0_i32 = arith.constant 0 : i32
    %c0_i32_0 = arith.constant 0 : i32
    return %c0_i32, %arg1 : i32, i32
  }
  func.func @transform_4(%arg0: i32, %arg1: i32) -> (i32, i32) {
    %c0_i32 = arith.constant 0 : i32
    %c0_i32_0 = arith.constant 0 : i32
    return %arg1, %c0_i32 : i32, i32
  }
  func.func @transform_5(%arg0: i32, %arg1: i32) -> (i32, i32) {
    %c0_i32 = arith.constant 0 : i32
    %c0_i32_0 = arith.constant 0 : i32
    return %arg0, %c0_i32 : i32, i32
  }
}

module attributes {stable_mosaic.version = 11 : i64} {
  func.func @flash_attn_kernel(%arg0: i32, %arg1: i32, %arg2: i32, %arg3: memref<1x16x128xbf16, #tpu.memory_space<vmem>>, %arg4: memref<1x16x128xbf16, #tpu.memory_space<vmem>>, %arg5: memref<1x16x128xbf16, #tpu.memory_space<vmem>>, %arg6: memref<1x16x128xbf16, #tpu.memory_space<vmem>>, %arg7: memref<4x16x1xf32, #tpu.memory_space<vmem>>, %arg8: memref<4x16x1xf32, #tpu.memory_space<vmem>>, %arg9: memref<16x128xf32, #tpu.memory_space<vmem>>) attributes {dimension_semantics = [#tpu.dimension_semantics<parallel>, #tpu.dimension_semantics<parallel>, #tpu.dimension_semantics<arbitrary>], iteration_bounds = array<i64: 2, 1, 1>, scalar_prefetch = 0 : i64, scratch_operands = 3 : i64, tpu.core_type = #tpu.core_type<tc>, window_params = [{transform_indices = @transform_0, window_bounds = array<i64: 1, 16, 128>}, {transform_indices = @transform_1, window_bounds = array<i64: 1, 16, 128>}, {transform_indices = @transform_2, window_bounds = array<i64: 1, 16, 128>}, {transform_indices = @transform_3, window_bounds = array<i64: 1, 16, 128>}]} {
    %c0_i32 = arith.constant 0 : i32
    %0 = arith.cmpi eq, %arg2, %c0_i32 : i32
    %1 = arith.extui %0 : i1 to i32
    %c0_i32_0 = arith.constant 0 : i32
    %2 = arith.cmpi ne, %1, %c0_i32_0 : i32
    scf.if %2 {
      %cst = arith.constant -1.000000e+30 : f32
      %9 = vector.broadcast %cst : f32 to vector<4x16x1xf32>
      %c0 = arith.constant 0 : index
      %c0_4 = arith.constant 0 : index
      %c0_5 = arith.constant 0 : index
      %10 = vector.load %arg7[%c0, %c0_4, %c0_5] : memref<4x16x1xf32, #tpu.memory_space<vmem>>, vector<4x16x1xf32>
      tpu.vector_store %arg7[%c0, %c0_4, %c0_5], %9 {strides = array<i32>} : memref<4x16x1xf32, #tpu.memory_space<vmem>>, vector<4x16x1xf32>,
      %cst_6 = arith.constant 0.000000e+00 : f32
      %11 = vector.broadcast %cst_6 : f32 to vector<4x16x1xf32>
      %c0_7 = arith.constant 0 : index
      %c0_8 = arith.constant 0 : index
      %c0_9 = arith.constant 0 : index
      %12 = vector.load %arg8[%c0_7, %c0_8, %c0_9] : memref<4x16x1xf32, #tpu.memory_space<vmem>>, vector<4x16x1xf32>
      tpu.vector_store %arg8[%c0_7, %c0_8, %c0_9], %11 {strides = array<i32>} : memref<4x16x1xf32, #tpu.memory_space<vmem>>, vector<4x16x1xf32>,
      %cst_10 = arith.constant 0.000000e+00 : f32
      %13 = vector.broadcast %cst_10 : f32 to vector<16x128xf32>
      %c0_11 = arith.constant 0 : index
      %c0_12 = arith.constant 0 : index
      %14 = vector.load %arg9[%c0_11, %c0_12] : memref<16x128xf32, #tpu.memory_space<vmem>>, vector<16x128xf32>
      tpu.vector_store %arg9[%c0_11, %c0_12], %13 {strides = array<i32>} : memref<16x128xf32, #tpu.memory_space<vmem>>, vector<16x128xf32>,
    } else {
    }
    %3 = arith.cmpi sle, %arg2, %arg1 : i32
    %4 = arith.extui %3 : i1 to i32
    %c0_i32_1 = arith.constant 0 : i32
    %5 = arith.cmpi ne, %4, %c0_i32_1 : i32
    scf.if %5 {
      %9 = tpu.iota {dimensions = array<i32: 0>} : vector<16x16xi32>
      %c16_i32 = arith.constant 16 : i32
      %10 = arith.muli %arg1, %c16_i32 : i32
      %11 = vector.broadcast %10 : i32 to vector<16x16xi32>
      %12 = arith.addi %9, %11 : vector<16x16xi32>
      %13 = tpu.iota {dimensions = array<i32: 1>} : vector<16x16xi32>
      %c16_i32_4 = arith.constant 16 : i32
      %14 = arith.muli %arg2, %c16_i32_4 : i32
      %15 = vector.broadcast %14 : i32 to vector<16x16xi32>
      %16 = arith.addi %13, %15 : vector<16x16xi32>
      %17 = arith.cmpi sle, %16, %12 : vector<16x16xi32>
      %c0 = arith.constant 0 : index
      %c0_5 = arith.constant 0 : index
      %c0_6 = arith.constant 0 : index
      %18 = vector.load %arg3[%c0, %c0_5, %c0_6] : memref<1x16x128xbf16, #tpu.memory_space<vmem>>, vector<1x16x32xbf16>
      %19 = vector.shape_cast %18 : vector<1x16x32xbf16> to vector<16x32xbf16>
      %c0_7 = arith.constant 0 : index
      %c0_8 = arith.constant 0 : index
      %c0_9 = arith.constant 0 : index
      %20 = vector.load %arg4[%c0_7, %c0_8, %c0_9] : memref<1x16x128xbf16, #tpu.memory_space<vmem>>, vector<1x16x32xbf16>
      %21 = vector.shape_cast %20 : vector<1x16x32xbf16> to vector<16x32xbf16>
      %c0_10 = arith.constant 0 : index
      %c0_11 = arith.constant 0 : index
      %c0_12 = arith.constant 0 : index
      %22 = vector.load %arg5[%c0_10, %c0_11, %c0_12] : memref<1x16x128xbf16, #tpu.memory_space<vmem>>, vector<1x16x32xbf16>
      %23 = vector.shape_cast %22 : vector<1x16x32xbf16> to vector<16x32xbf16>
      %cst = arith.constant dense<0.000000e+00> : vector<16x16xf32>
      %24 = tpu.matmul %19, %21, %cst {dimension_numbers = #tpu.dot_dimension_numbers<[1], [1], [0], [0], [0, 0, 1, 0], [], []>} : vector<16x32xbf16>, vector<16x32xbf16>, vector<16x16xf32> -> vector<16x16xf32>
      %cst_13 = arith.constant -1.000000e+30 : f32
      %25 = vector.broadcast %cst_13 : f32 to vector<16x16xf32>
      %26 = arith.select %17, %24, %25 : vector<16x16xi1>, vector<16x16xf32>
      %c0_14 = arith.constant 0 : index
      %c0_15 = arith.constant 0 : index
      %c0_16 = arith.constant 0 : index
      %27 = vector.load %arg7[%c0_14, %c0_15, %c0_16] : memref<4x16x1xf32, #tpu.memory_space<vmem>>, vector<1x16x1xf32>
      %28 = vector.shape_cast %27 : vector<1x16x1xf32> to vector<16x1xf32>
      %cst_17 = arith.constant dense<0xFF800000> : vector<16xf32>
      %29 = vector.multi_reduction <maximumf>, %26, %cst_17 [1] : vector<16x16xf32> to vector<16xf32>
      %30 = vector.shape_cast %29 : vector<16xf32> to vector<16x1xf32>
      %31 = arith.maximumf %28, %30 : vector<16x1xf32>
      %32 = arith.subf %28, %31 : vector<16x1xf32>
      %33 = math.exp %32 : vector<16x1xf32>
      %34 = vector.broadcast %31 : vector<16x1xf32> to vector<16x16xf32>
      %35 = arith.subf %26, %34 : vector<16x16xf32>
      %36 = math.exp %35 : vector<16x16xf32>
      %c0_18 = arith.constant 0 : index
      %c0_19 = arith.constant 0 : index
      %c0_20 = arith.constant 0 : index
      %37 = vector.load %arg8[%c0_18, %c0_19, %c0_20] : memref<4x16x1xf32, #tpu.memory_space<vmem>>, vector<1x16x1xf32>
      %38 = vector.shape_cast %37 : vector<1x16x1xf32> to vector<16x1xf32>
      %39 = arith.mulf %33, %38 : vector<16x1xf32>
      %cst_21 = arith.constant dense<0.000000e+00> : vector<16xf32>
      %40 = vector.multi_reduction <add>, %36, %cst_21 [1] : vector<16x16xf32> to vector<16xf32>
      %41 = vector.shape_cast %40 : vector<16xf32> to vector<16x1xf32>
      %42 = arith.addf %39, %41 : vector<16x1xf32>
      %c0_22 = arith.constant 0 : index
      %c0_23 = arith.constant 0 : index
      %c0_24 = arith.constant 0 : index
      %43 = vector.load %arg8[%c0_22, %c0_23, %c0_24] : memref<4x16x1xf32, #tpu.memory_space<vmem>>, vector<1x16x1xf32>
      %44 = vector.shape_cast %43 : vector<1x16x1xf32> to vector<16x1xf32>
      %45 = vector.shape_cast %42 : vector<16x1xf32> to vector<1x16x1xf32>
      tpu.vector_store %arg8[%c0_22, %c0_23, %c0_24], %45 {strides = array<i32>} : memref<4x16x1xf32, #tpu.memory_space<vmem>>, vector<1x16x1xf32>,
      %c0_25 = arith.constant 0 : index
      %c0_26 = arith.constant 0 : index
      %46 = vector.load %arg9[%c0_25, %c0_26] : memref<16x128xf32, #tpu.memory_space<vmem>>, vector<16x32xf32>
      %47 = vector.broadcast %33 : vector<16x1xf32> to vector<16x32xf32>
      %48 = arith.mulf %47, %46 : vector<16x32xf32>
      %49 = arith.truncf %36 : vector<16x16xf32> to vector<16x16xbf16>
      %cst_27 = arith.constant dense<0.000000e+00> : vector<16x32xf32>
      %50 = tpu.matmul %49, %23, %cst_27 {dimension_numbers = #tpu.dot_dimension_numbers<[1], [0], [0], [1], [0, 0, 1, 1], [], []>} : vector<16x16xbf16>, vector<16x32xbf16>, vector<16x32xf32> -> vector<16x32xf32>
      %51 = arith.addf %48, %50 : vector<16x32xf32>
      %c0_28 = arith.constant 0 : index
      %c0_29 = arith.constant 0 : index
      %52 = vector.load %arg9[%c0_28, %c0_29] : memref<16x128xf32, #tpu.memory_space<vmem>>, vector<16x32xf32>
      tpu.vector_store %arg9[%c0_28, %c0_29], %51 {strides = array<i32>} : memref<16x128xf32, #tpu.memory_space<vmem>>, vector<16x32xf32>,
      %c0_30 = arith.constant 0 : index
      %c0_31 = arith.constant 0 : index
      %c0_32 = arith.constant 0 : index
      %53 = vector.load %arg7[%c0_30, %c0_31, %c0_32] : memref<4x16x1xf32, #tpu.memory_space<vmem>>, vector<1x16x1xf32>
      %54 = vector.shape_cast %53 : vector<1x16x1xf32> to vector<16x1xf32>
      %55 = vector.shape_cast %31 : vector<16x1xf32> to vector<1x16x1xf32>
      tpu.vector_store %arg7[%c0_30, %c0_31, %c0_32], %55 {strides = array<i32>} : memref<4x16x1xf32, #tpu.memory_space<vmem>>, vector<1x16x1xf32>,
      %c0_33 = arith.constant 0 : index
      %c0_34 = arith.constant 0 : index
      %c32 = arith.constant 32 : index
      %56 = vector.load %arg3[%c0_33, %c0_34, %c32] : memref<1x16x128xbf16, #tpu.memory_space<vmem>>, vector<1x16x32xbf16>
      %57 = vector.shape_cast %56 : vector<1x16x32xbf16> to vector<16x32xbf16>
      %c0_35 = arith.constant 0 : index
      %c0_36 = arith.constant 0 : index
      %c32_37 = arith.constant 32 : index
      %58 = vector.load %arg4[%c0_35, %c0_36, %c32_37] : memref<1x16x128xbf16, #tpu.memory_space<vmem>>, vector<1x16x32xbf16>
      %59 = vector.shape_cast %58 : vector<1x16x32xbf16> to vector<16x32xbf16>
      %c0_38 = arith.constant 0 : index
      %c0_39 = arith.constant 0 : index
      %c32_40 = arith.constant 32 : index
      %60 = vector.load %arg5[%c0_38, %c0_39, %c32_40] : memref<1x16x128xbf16, #tpu.memory_space<vmem>>, vector<1x16x32xbf16>
      %61 = vector.shape_cast %60 : vector<1x16x32xbf16> to vector<16x32xbf16>
      %cst_41 = arith.constant dense<0.000000e+00> : vector<16x16xf32>
      %62 = tpu.matmul %57, %59, %cst_41 {dimension_numbers = #tpu.dot_dimension_numbers<[1], [1], [0], [0], [0, 0, 1, 0], [], []>} : vector<16x32xbf16>, vector<16x32xbf16>, vector<16x16xf32> -> vector<16x16xf32>
      %cst_42 = arith.constant -1.000000e+30 : f32
      %63 = vector.broadcast %cst_42 : f32 to vector<16x16xf32>
      %64 = arith.select %17, %62, %63 : vector<16x16xi1>, vector<16x16xf32>
      %c1 = arith.constant 1 : index
      %c0_43 = arith.constant 0 : index
      %c0_44 = arith.constant 0 : index
      %65 = vector.load %arg7[%c1, %c0_43, %c0_44] : memref<4x16x1xf32, #tpu.memory_space<vmem>>, vector<1x16x1xf32>
      %66 = vector.shape_cast %65 : vector<1x16x1xf32> to vector<16x1xf32>
      %cst_45 = arith.constant dense<0xFF800000> : vector<16xf32>
      %67 = vector.multi_reduction <maximumf>, %64, %cst_45 [1] : vector<16x16xf32> to vector<16xf32>
      %68 = vector.shape_cast %67 : vector<16xf32> to vector<16x1xf32>
      %69 = arith.maximumf %66, %68 : vector<16x1xf32>
      %70 = arith.subf %66, %69 : vector<16x1xf32>
      %71 = math.exp %70 : vector<16x1xf32>
      %72 = vector.broadcast %69 : vector<16x1xf32> to vector<16x16xf32>
      %73 = arith.subf %64, %72 : vector<16x16xf32>
      %74 = math.exp %73 : vector<16x16xf32>
      %c1_46 = arith.constant 1 : index
      %c0_47 = arith.constant 0 : index
      %c0_48 = arith.constant 0 : index
      %75 = vector.load %arg8[%c1_46, %c0_47, %c0_48] : memref<4x16x1xf32, #tpu.memory_space<vmem>>, vector<1x16x1xf32>
      %76 = vector.shape_cast %75 : vector<1x16x1xf32> to vector<16x1xf32>
      %77 = arith.mulf %71, %76 : vector<16x1xf32>
      %cst_49 = arith.constant dense<0.000000e+00> : vector<16xf32>
      %78 = vector.multi_reduction <add>, %74, %cst_49 [1] : vector<16x16xf32> to vector<16xf32>
      %79 = vector.shape_cast %78 : vector<16xf32> to vector<16x1xf32>
      %80 = arith.addf %77, %79 : vector<16x1xf32>
      %c1_50 = arith.constant 1 : index
      %c0_51 = arith.constant 0 : index
      %c0_52 = arith.constant 0 : index
      %81 = vector.load %arg8[%c1_50, %c0_51, %c0_52] : memref<4x16x1xf32, #tpu.memory_space<vmem>>, vector<1x16x1xf32>
      %82 = vector.shape_cast %81 : vector<1x16x1xf32> to vector<16x1xf32>
      %83 = vector.shape_cast %80 : vector<16x1xf32> to vector<1x16x1xf32>
      tpu.vector_store %arg8[%c1_50, %c0_51, %c0_52], %83 {strides = array<i32>} : memref<4x16x1xf32, #tpu.memory_space<vmem>>, vector<1x16x1xf32>,
      %c0_53 = arith.constant 0 : index
      %c32_54 = arith.constant 32 : index
      %84 = vector.load %arg9[%c0_53, %c32_54] : memref<16x128xf32, #tpu.memory_space<vmem>>, vector<16x32xf32>
      %85 = vector.broadcast %71 : vector<16x1xf32> to vector<16x32xf32>
      %86 = arith.mulf %85, %84 : vector<16x32xf32>
      %87 = arith.truncf %74 : vector<16x16xf32> to vector<16x16xbf16>
      %cst_55 = arith.constant dense<0.000000e+00> : vector<16x32xf32>
      %88 = tpu.matmul %87, %61, %cst_55 {dimension_numbers = #tpu.dot_dimension_numbers<[1], [0], [0], [1], [0, 0, 1, 1], [], []>} : vector<16x16xbf16>, vector<16x32xbf16>, vector<16x32xf32> -> vector<16x32xf32>
      %89 = arith.addf %86, %88 : vector<16x32xf32>
      %c0_56 = arith.constant 0 : index
      %c32_57 = arith.constant 32 : index
      %90 = vector.load %arg9[%c0_56, %c32_57] : memref<16x128xf32, #tpu.memory_space<vmem>>, vector<16x32xf32>
      tpu.vector_store %arg9[%c0_56, %c32_57], %89 {strides = array<i32>} : memref<16x128xf32, #tpu.memory_space<vmem>>, vector<16x32xf32>,
      %c1_58 = arith.constant 1 : index
      %c0_59 = arith.constant 0 : index
      %c0_60 = arith.constant 0 : index
      %91 = vector.load %arg7[%c1_58, %c0_59, %c0_60] : memref<4x16x1xf32, #tpu.memory_space<vmem>>, vector<1x16x1xf32>
      %92 = vector.shape_cast %91 : vector<1x16x1xf32> to vector<16x1xf32>
      %93 = vector.shape_cast %69 : vector<16x1xf32> to vector<1x16x1xf32>
      tpu.vector_store %arg7[%c1_58, %c0_59, %c0_60], %93 {strides = array<i32>} : memref<4x16x1xf32, #tpu.memory_space<vmem>>, vector<1x16x1xf32>,
      %c0_61 = arith.constant 0 : index
      %c0_62 = arith.constant 0 : index
      %c64 = arith.constant 64 : index
      %94 = vector.load %arg3[%c0_61, %c0_62, %c64] : memref<1x16x128xbf16, #tpu.memory_space<vmem>>, vector<1x16x32xbf16>
      %95 = vector.shape_cast %94 : vector<1x16x32xbf16> to vector<16x32xbf16>
      %c0_63 = arith.constant 0 : index
      %c0_64 = arith.constant 0 : index
      %c64_65 = arith.constant 64 : index
      %96 = vector.load %arg4[%c0_63, %c0_64, %c64_65] : memref<1x16x128xbf16, #tpu.memory_space<vmem>>, vector<1x16x32xbf16>
      %97 = vector.shape_cast %96 : vector<1x16x32xbf16> to vector<16x32xbf16>
      %c0_66 = arith.constant 0 : index
      %c0_67 = arith.constant 0 : index
      %c64_68 = arith.constant 64 : index
      %98 = vector.load %arg5[%c0_66, %c0_67, %c64_68] : memref<1x16x128xbf16, #tpu.memory_space<vmem>>, vector<1x16x32xbf16>
      %99 = vector.shape_cast %98 : vector<1x16x32xbf16> to vector<16x32xbf16>
      %cst_69 = arith.constant dense<0.000000e+00> : vector<16x16xf32>
      %100 = tpu.matmul %95, %97, %cst_69 {dimension_numbers = #tpu.dot_dimension_numbers<[1], [1], [0], [0], [0, 0, 1, 0], [], []>} : vector<16x32xbf16>, vector<16x32xbf16>, vector<16x16xf32> -> vector<16x16xf32>
      %cst_70 = arith.constant -1.000000e+30 : f32
      %101 = vector.broadcast %cst_70 : f32 to vector<16x16xf32>
      %102 = arith.select %17, %100, %101 : vector<16x16xi1>, vector<16x16xf32>
      %c2 = arith.constant 2 : index
      %c0_71 = arith.constant 0 : index
      %c0_72 = arith.constant 0 : index
      %103 = vector.load %arg7[%c2, %c0_71, %c0_72] : memref<4x16x1xf32, #tpu.memory_space<vmem>>, vector<1x16x1xf32>
      %104 = vector.shape_cast %103 : vector<1x16x1xf32> to vector<16x1xf32>
      %cst_73 = arith.constant dense<0xFF800000> : vector<16xf32>
      %105 = vector.multi_reduction <maximumf>, %102, %cst_73 [1] : vector<16x16xf32> to vector<16xf32>
      %106 = vector.shape_cast %105 : vector<16xf32> to vector<16x1xf32>
      %107 = arith.maximumf %104, %106 : vector<16x1xf32>
      %108 = arith.subf %104, %107 : vector<16x1xf32>
      %109 = math.exp %108 : vector<16x1xf32>
      %110 = vector.broadcast %107 : vector<16x1xf32> to vector<16x16xf32>
      %111 = arith.subf %102, %110 : vector<16x16xf32>
      %112 = math.exp %111 : vector<16x16xf32>
      %c2_74 = arith.constant 2 : index
      %c0_75 = arith.constant 0 : index
      %c0_76 = arith.constant 0 : index
      %113 = vector.load %arg8[%c2_74, %c0_75, %c0_76] : memref<4x16x1xf32, #tpu.memory_space<vmem>>, vector<1x16x1xf32>
      %114 = vector.shape_cast %113 : vector<1x16x1xf32> to vector<16x1xf32>
      %115 = arith.mulf %109, %114 : vector<16x1xf32>
      %cst_77 = arith.constant dense<0.000000e+00> : vector<16xf32>
      %116 = vector.multi_reduction <add>, %112, %cst_77 [1] : vector<16x16xf32> to vector<16xf32>
      %117 = vector.shape_cast %116 : vector<16xf32> to vector<16x1xf32>
      %118 = arith.addf %115, %117 : vector<16x1xf32>
      %c2_78 = arith.constant 2 : index
      %c0_79 = arith.constant 0 : index
      %c0_80 = arith.constant 0 : index
      %119 = vector.load %arg8[%c2_78, %c0_79, %c0_80] : memref<4x16x1xf32, #tpu.memory_space<vmem>>, vector<1x16x1xf32>
      %120 = vector.shape_cast %119 : vector<1x16x1xf32> to vector<16x1xf32>
      %121 = vector.shape_cast %118 : vector<16x1xf32> to vector<1x16x1xf32>
      tpu.vector_store %arg8[%c2_78, %c0_79, %c0_80], %121 {strides = array<i32>} : memref<4x16x1xf32, #tpu.memory_space<vmem>>, vector<1x16x1xf32>,
      %c0_81 = arith.constant 0 : index
      %c64_82 = arith.constant 64 : index
      %122 = vector.load %arg9[%c0_81, %c64_82] : memref<16x128xf32, #tpu.memory_space<vmem>>, vector<16x32xf32>
      %123 = vector.broadcast %109 : vector<16x1xf32> to vector<16x32xf32>
      %124 = arith.mulf %123, %122 : vector<16x32xf32>
      %125 = arith.truncf %112 : vector<16x16xf32> to vector<16x16xbf16>
      %cst_83 = arith.constant dense<0.000000e+00> : vector<16x32xf32>
      %126 = tpu.matmul %125, %99, %cst_83 {dimension_numbers = #tpu.dot_dimension_numbers<[1], [0], [0], [1], [0, 0, 1, 1], [], []>} : vector<16x16xbf16>, vector<16x32xbf16>, vector<16x32xf32> -> vector<16x32xf32>
      %127 = arith.addf %124, %126 : vector<16x32xf32>
      %c0_84 = arith.constant 0 : index
      %c64_85 = arith.constant 64 : index
      %128 = vector.load %arg9[%c0_84, %c64_85] : memref<16x128xf32, #tpu.memory_space<vmem>>, vector<16x32xf32>
      tpu.vector_store %arg9[%c0_84, %c64_85], %127 {strides = array<i32>} : memref<16x128xf32, #tpu.memory_space<vmem>>, vector<16x32xf32>,
      %c2_86 = arith.constant 2 : index
      %c0_87 = arith.constant 0 : index
      %c0_88 = arith.constant 0 : index
      %129 = vector.load %arg7[%c2_86, %c0_87, %c0_88] : memref<4x16x1xf32, #tpu.memory_space<vmem>>, vector<1x16x1xf32>
      %130 = vector.shape_cast %129 : vector<1x16x1xf32> to vector<16x1xf32>
      %131 = vector.shape_cast %107 : vector<16x1xf32> to vector<1x16x1xf32>
      tpu.vector_store %arg7[%c2_86, %c0_87, %c0_88], %131 {strides = array<i32>} : memref<4x16x1xf32, #tpu.memory_space<vmem>>, vector<1x16x1xf32>,
      %c0_89 = arith.constant 0 : index
      %c0_90 = arith.constant 0 : index
      %c96 = arith.constant 96 : index
      %132 = vector.load %arg3[%c0_89, %c0_90, %c96] : memref<1x16x128xbf16, #tpu.memory_space<vmem>>, vector<1x16x32xbf16>
      %133 = vector.shape_cast %132 : vector<1x16x32xbf16> to vector<16x32xbf16>
      %c0_91 = arith.constant 0 : index
      %c0_92 = arith.constant 0 : index
      %c96_93 = arith.constant 96 : index
      %134 = vector.load %arg4[%c0_91, %c0_92, %c96_93] : memref<1x16x128xbf16, #tpu.memory_space<vmem>>, vector<1x16x32xbf16>
      %135 = vector.shape_cast %134 : vector<1x16x32xbf16> to vector<16x32xbf16>
      %c0_94 = arith.constant 0 : index
      %c0_95 = arith.constant 0 : index
      %c96_96 = arith.constant 96 : index
      %136 = vector.load %arg5[%c0_94, %c0_95, %c96_96] : memref<1x16x128xbf16, #tpu.memory_space<vmem>>, vector<1x16x32xbf16>
      %137 = vector.shape_cast %136 : vector<1x16x32xbf16> to vector<16x32xbf16>
      %cst_97 = arith.constant dense<0.000000e+00> : vector<16x16xf32>
      %138 = tpu.matmul %133, %135, %cst_97 {dimension_numbers = #tpu.dot_dimension_numbers<[1], [1], [0], [0], [0, 0, 1, 0], [], []>} : vector<16x32xbf16>, vector<16x32xbf16>, vector<16x16xf32> -> vector<16x16xf32>
      %cst_98 = arith.constant -1.000000e+30 : f32
      %139 = vector.broadcast %cst_98 : f32 to vector<16x16xf32>
      %140 = arith.select %17, %138, %139 : vector<16x16xi1>, vector<16x16xf32>
      %c3 = arith.constant 3 : index
      %c0_99 = arith.constant 0 : index
      %c0_100 = arith.constant 0 : index
      %141 = vector.load %arg7[%c3, %c0_99, %c0_100] : memref<4x16x1xf32, #tpu.memory_space<vmem>>, vector<1x16x1xf32>
      %142 = vector.shape_cast %141 : vector<1x16x1xf32> to vector<16x1xf32>
      %cst_101 = arith.constant dense<0xFF800000> : vector<16xf32>
      %143 = vector.multi_reduction <maximumf>, %140, %cst_101 [1] : vector<16x16xf32> to vector<16xf32>
      %144 = vector.shape_cast %143 : vector<16xf32> to vector<16x1xf32>
      %145 = arith.maximumf %142, %144 : vector<16x1xf32>
      %146 = arith.subf %142, %145 : vector<16x1xf32>
      %147 = math.exp %146 : vector<16x1xf32>
      %148 = vector.broadcast %145 : vector<16x1xf32> to vector<16x16xf32>
      %149 = arith.subf %140, %148 : vector<16x16xf32>
      %150 = math.exp %149 : vector<16x16xf32>
      %c3_102 = arith.constant 3 : index
      %c0_103 = arith.constant 0 : index
      %c0_104 = arith.constant 0 : index
      %151 = vector.load %arg8[%c3_102, %c0_103, %c0_104] : memref<4x16x1xf32, #tpu.memory_space<vmem>>, vector<1x16x1xf32>
      %152 = vector.shape_cast %151 : vector<1x16x1xf32> to vector<16x1xf32>
      %153 = arith.mulf %147, %152 : vector<16x1xf32>
      %cst_105 = arith.constant dense<0.000000e+00> : vector<16xf32>
      %154 = vector.multi_reduction <add>, %150, %cst_105 [1] : vector<16x16xf32> to vector<16xf32>
      %155 = vector.shape_cast %154 : vector<16xf32> to vector<16x1xf32>
      %156 = arith.addf %153, %155 : vector<16x1xf32>
      %c3_106 = arith.constant 3 : index
      %c0_107 = arith.constant 0 : index
      %c0_108 = arith.constant 0 : index
      %157 = vector.load %arg8[%c3_106, %c0_107, %c0_108] : memref<4x16x1xf32, #tpu.memory_space<vmem>>, vector<1x16x1xf32>
      %158 = vector.shape_cast %157 : vector<1x16x1xf32> to vector<16x1xf32>
      %159 = vector.shape_cast %156 : vector<16x1xf32> to vector<1x16x1xf32>
      tpu.vector_store %arg8[%c3_106, %c0_107, %c0_108], %159 {strides = array<i32>} : memref<4x16x1xf32, #tpu.memory_space<vmem>>, vector<1x16x1xf32>,
      %c0_109 = arith.constant 0 : index
      %c96_110 = arith.constant 96 : index
      %160 = vector.load %arg9[%c0_109, %c96_110] : memref<16x128xf32, #tpu.memory_space<vmem>>, vector<16x32xf32>
      %161 = vector.broadcast %147 : vector<16x1xf32> to vector<16x32xf32>
      %162 = arith.mulf %161, %160 : vector<16x32xf32>
      %163 = arith.truncf %150 : vector<16x16xf32> to vector<16x16xbf16>
      %cst_111 = arith.constant dense<0.000000e+00> : vector<16x32xf32>
      %164 = tpu.matmul %163, %137, %cst_111 {dimension_numbers = #tpu.dot_dimension_numbers<[1], [0], [0], [1], [0, 0, 1, 1], [], []>} : vector<16x16xbf16>, vector<16x32xbf16>, vector<16x32xf32> -> vector<16x32xf32>
      %165 = arith.addf %162, %164 : vector<16x32xf32>
      %c0_112 = arith.constant 0 : index
      %c96_113 = arith.constant 96 : index
      %166 = vector.load %arg9[%c0_112, %c96_113] : memref<16x128xf32, #tpu.memory_space<vmem>>, vector<16x32xf32>
      tpu.vector_store %arg9[%c0_112, %c96_113], %165 {strides = array<i32>} : memref<16x128xf32, #tpu.memory_space<vmem>>, vector<16x32xf32>,
      %c3_114 = arith.constant 3 : index
      %c0_115 = arith.constant 0 : index
      %c0_116 = arith.constant 0 : index
      %167 = vector.load %arg7[%c3_114, %c0_115, %c0_116] : memref<4x16x1xf32, #tpu.memory_space<vmem>>, vector<1x16x1xf32>
      %168 = vector.shape_cast %167 : vector<1x16x1xf32> to vector<16x1xf32>
      %169 = vector.shape_cast %145 : vector<16x1xf32> to vector<1x16x1xf32>
      tpu.vector_store %arg7[%c3_114, %c0_115, %c0_116], %169 {strides = array<i32>} : memref<4x16x1xf32, #tpu.memory_space<vmem>>, vector<1x16x1xf32>,
    } else {
    }
    %c0_i32_2 = arith.constant 0 : i32
    %6 = arith.cmpi eq, %arg2, %c0_i32_2 : i32
    %7 = arith.extui %6 : i1 to i32
    %c0_i32_3 = arith.constant 0 : i32
    %8 = arith.cmpi ne, %7, %c0_i32_3 : i32
    scf.if %8 {
      %c0 = arith.constant 0 : index
      %c0_4 = arith.constant 0 : index
      %c0_5 = arith.constant 0 : index
      %9 = vector.load %arg8[%c0, %c0_4, %c0_5] : memref<4x16x1xf32, #tpu.memory_space<vmem>>, vector<1x16x1xf32>
      %10 = vector.shape_cast %9 : vector<1x16x1xf32> to vector<16x1xf32>
      %11 = tpu.reciprocal %10 : vector<16x1xf32> -> vector<16x1xf32>
      %c0_6 = arith.constant 0 : index
      %c0_7 = arith.constant 0 : index
      %12 = vector.load %arg9[%c0_6, %c0_7] : memref<16x128xf32, #tpu.memory_space<vmem>>, vector<16x32xf32>
      %13 = vector.broadcast %11 : vector<16x1xf32> to vector<16x32xf32>
      %14 = arith.mulf %12, %13 : vector<16x32xf32>
      %15 = arith.truncf %14 : vector<16x32xf32> to vector<16x32xbf16>
      %c0_8 = arith.constant 0 : index
      %c0_9 = arith.constant 0 : index
      %c0_10 = arith.constant 0 : index
      %16 = vector.load %arg6[%c0_8, %c0_9, %c0_10] : memref<1x16x128xbf16, #tpu.memory_space<vmem>>, vector<1x16x32xbf16>
      %17 = vector.shape_cast %16 : vector<1x16x32xbf16> to vector<16x32xbf16>
      %18 = vector.shape_cast %15 : vector<16x32xbf16> to vector<1x16x32xbf16>
      tpu.vector_store %arg6[%c0_8, %c0_9, %c0_10], %18 {strides = array<i32>} : memref<1x16x128xbf16, #tpu.memory_space<vmem>>, vector<1x16x32xbf16>,
      %c1 = arith.constant 1 : index
      %c0_11 = arith.constant 0 : index
      %c0_12 = arith.constant 0 : index
      %19 = vector.load %arg8[%c1, %c0_11, %c0_12] : memref<4x16x1xf32, #tpu.memory_space<vmem>>, vector<1x16x1xf32>
      %20 = vector.shape_cast %19 : vector<1x16x1xf32> to vector<16x1xf32>
      %21 = tpu.reciprocal %20 : vector<16x1xf32> -> vector<16x1xf32>
      %c0_13 = arith.constant 0 : index
      %c32 = arith.constant 32 : index
      %22 = vector.load %arg9[%c0_13, %c32] : memref<16x128xf32, #tpu.memory_space<vmem>>, vector<16x32xf32>
      %23 = vector.broadcast %21 : vector<16x1xf32> to vector<16x32xf32>
      %24 = arith.mulf %22, %23 : vector<16x32xf32>
      %25 = arith.truncf %24 : vector<16x32xf32> to vector<16x32xbf16>
      %c0_14 = arith.constant 0 : index
      %c0_15 = arith.constant 0 : index
      %c32_16 = arith.constant 32 : index
      %26 = vector.load %arg6[%c0_14, %c0_15, %c32_16] : memref<1x16x128xbf16, #tpu.memory_space<vmem>>, vector<1x16x32xbf16>
      %27 = vector.shape_cast %26 : vector<1x16x32xbf16> to vector<16x32xbf16>
      %28 = vector.shape_cast %25 : vector<16x32xbf16> to vector<1x16x32xbf16>
      tpu.vector_store %arg6[%c0_14, %c0_15, %c32_16], %28 {strides = array<i32>} : memref<1x16x128xbf16, #tpu.memory_space<vmem>>, vector<1x16x32xbf16>,
      %c2 = arith.constant 2 : index
      %c0_17 = arith.constant 0 : index
      %c0_18 = arith.constant 0 : index
      %29 = vector.load %arg8[%c2, %c0_17, %c0_18] : memref<4x16x1xf32, #tpu.memory_space<vmem>>, vector<1x16x1xf32>
      %30 = vector.shape_cast %29 : vector<1x16x1xf32> to vector<16x1xf32>
      %31 = tpu.reciprocal %30 : vector<16x1xf32> -> vector<16x1xf32>
      %c0_19 = arith.constant 0 : index
      %c64 = arith.constant 64 : index
      %32 = vector.load %arg9[%c0_19, %c64] : memref<16x128xf32, #tpu.memory_space<vmem>>, vector<16x32xf32>
      %33 = vector.broadcast %31 : vector<16x1xf32> to vector<16x32xf32>
      %34 = arith.mulf %32, %33 : vector<16x32xf32>
      %35 = arith.truncf %34 : vector<16x32xf32> to vector<16x32xbf16>
      %c0_20 = arith.constant 0 : index
      %c0_21 = arith.constant 0 : index
      %c64_22 = arith.constant 64 : index
      %36 = vector.load %arg6[%c0_20, %c0_21, %c64_22] : memref<1x16x128xbf16, #tpu.memory_space<vmem>>, vector<1x16x32xbf16>
      %37 = vector.shape_cast %36 : vector<1x16x32xbf16> to vector<16x32xbf16>
      %38 = vector.shape_cast %35 : vector<16x32xbf16> to vector<1x16x32xbf16>
      tpu.vector_store %arg6[%c0_20, %c0_21, %c64_22], %38 {strides = array<i32>} : memref<1x16x128xbf16, #tpu.memory_space<vmem>>, vector<1x16x32xbf16>,
      %c3 = arith.constant 3 : index
      %c0_23 = arith.constant 0 : index
      %c0_24 = arith.constant 0 : index
      %39 = vector.load %arg8[%c3, %c0_23, %c0_24] : memref<4x16x1xf32, #tpu.memory_space<vmem>>, vector<1x16x1xf32>
      %40 = vector.shape_cast %39 : vector<1x16x1xf32> to vector<16x1xf32>
      %41 = tpu.reciprocal %40 : vector<16x1xf32> -> vector<16x1xf32>
      %c0_25 = arith.constant 0 : index
      %c96 = arith.constant 96 : index
      %42 = vector.load %arg9[%c0_25, %c96] : memref<16x128xf32, #tpu.memory_space<vmem>>, vector<16x32xf32>
      %43 = vector.broadcast %41 : vector<16x1xf32> to vector<16x32xf32>
      %44 = arith.mulf %42, %43 : vector<16x32xf32>
      %45 = arith.truncf %44 : vector<16x32xf32> to vector<16x32xbf16>
      %c0_26 = arith.constant 0 : index
      %c0_27 = arith.constant 0 : index
      %c96_28 = arith.constant 96 : index
      %46 = vector.load %arg6[%c0_26, %c0_27, %c96_28] : memref<1x16x128xbf16, #tpu.memory_space<vmem>>, vector<1x16x32xbf16>
      %47 = vector.shape_cast %46 : vector<1x16x32xbf16> to vector<16x32xbf16>
      %48 = vector.shape_cast %45 : vector<16x32xbf16> to vector<1x16x32xbf16>
      tpu.vector_store %arg6[%c0_26, %c0_27, %c96_28], %48 {strides = array<i32>} : memref<1x16x128xbf16, #tpu.memory_space<vmem>>, vector<1x16x32xbf16>,
    } else {
    }
    return
  }
  func.func @transform_0(%arg0: i32, %arg1: i32, %arg2: i32) -> (i32, i32, i32) {
    %c0_i32 = arith.constant 0 : i32
    %c0_i32_0 = arith.constant 0 : i32
    return %arg0, %arg1, %c0_i32 : i32, i32, i32
  }
  func.func @transform_1(%arg0: i32, %arg1: i32, %arg2: i32) -> (i32, i32, i32) {
    %0 = arith.minsi %arg2, %arg1 : i32
    %c1_i32 = arith.constant 1 : i32
    %c0_i32 = arith.constant 0 : i32
    return %arg0, %0, %c1_i32 : i32, i32, i32
  }
  func.func @transform_2(%arg0: i32, %arg1: i32, %arg2: i32) -> (i32, i32, i32) {
    %0 = arith.minsi %arg2, %arg1 : i32
    %c2_i32 = arith.constant 2 : i32
    %c0_i32 = arith.constant 0 : i32
    return %arg0, %0, %c2_i32 : i32, i32, i32
  }
  func.func @transform_3(%arg0: i32, %arg1: i32, %arg2: i32) -> (i32, i32, i32) {
    %c0_i32 = arith.constant 0 : i32
    %c0_i32_0 = arith.constant 0 : i32
    return %arg0, %arg1, %c0_i32 : i32, i32, i32
  }
}

module attributes {stable_mosaic.version = 11 : i64} {
  func.func @rmsnorm_matmul_kernel(%arg0: i32, %arg1: i32, %arg2: memref<32x128xf32, #tpu.memory_space<vmem>>, %arg3: memref<1x128xf32, #tpu.memory_space<vmem>>, %arg4: memref<128x256xbf16, #tpu.memory_space<vmem>>, %arg5: memref<32x256xf32, #tpu.memory_space<vmem>>, %arg6: memref<32x128xbf16, #tpu.memory_space<vmem>>) attributes {dimension_semantics = [#tpu.dimension_semantics<parallel>, #tpu.dimension_semantics<arbitrary>], iteration_bounds = array<i64: 1, 1>, scalar_prefetch = 0 : i64, scratch_operands = 1 : i64, tpu.core_type = #tpu.core_type<tc>, window_params = [{transform_indices = @transform_0, window_bounds = array<i64: 32, 128>}, {pipeline_mode = #tpu.pipeline_mode<synchronous>, transform_indices = @transform_1, window_bounds = array<i64: 1, 128>}, {transform_indices = @transform_2, window_bounds = array<i64: 128, 256>}, {transform_indices = @transform_3, window_bounds = array<i64: 32, 256>}]} {
    %c0_i32 = arith.constant 0 : i32
    %0 = arith.cmpi eq, %arg1, %c0_i32 : i32
    %1 = arith.extui %0 : i1 to i32
    %c0_i32_0 = arith.constant 0 : i32
    %2 = arith.cmpi ne, %1, %c0_i32_0 : i32
    scf.if %2 {
      %c0_6 = arith.constant 0 : index
      %c0_7 = arith.constant 0 : index
      %7 = vector.load %arg2[%c0_6, %c0_7] : memref<32x128xf32, #tpu.memory_space<vmem>>, vector<32x128xf32>
      %8 = arith.mulf %7, %7 : vector<32x128xf32>
      %cst_8 = arith.constant dense<0.000000e+00> : vector<32xf32>
      %9 = vector.multi_reduction <add>, %8, %cst_8 [1] : vector<32x128xf32> to vector<32xf32>
      %10 = vector.shape_cast %9 : vector<32xf32> to vector<32x1xf32>
      %cst_9 = arith.constant 1.280000e+02 : f32
      %11 = vector.broadcast %cst_9 : f32 to vector<32x1xf32>
      %12 = arith.divf %10, %11 : vector<32x1xf32>
      %cst_10 = arith.constant 9.99999974E-6 : f32
      %13 = vector.broadcast %cst_10 : f32 to vector<32x1xf32>
      %14 = arith.addf %12, %13 : vector<32x1xf32>
      %15 = math.rsqrt %14 : vector<32x1xf32>
      %16 = vector.broadcast %15 : vector<32x1xf32> to vector<32x128xf32>
      %17 = arith.mulf %7, %16 : vector<32x128xf32>
      %c0_11 = arith.constant 0 : index
      %c0_12 = arith.constant 0 : index
      %18 = vector.load %arg3[%c0_11, %c0_12] : memref<1x128xf32, #tpu.memory_space<vmem>>, vector<1x128xf32>
      %19 = vector.broadcast %18 : vector<1x128xf32> to vector<32x128xf32>
      %20 = arith.mulf %17, %19 : vector<32x128xf32>
      %21 = arith.truncf %20 : vector<32x128xf32> to vector<32x128xbf16>
      %c0_13 = arith.constant 0 : index
      %c0_14 = arith.constant 0 : index
      %22 = vector.load %arg6[%c0_13, %c0_14] : memref<32x128xbf16, #tpu.memory_space<vmem>>, vector<32x128xbf16>
      tpu.vector_store %arg6[%c0_13, %c0_14], %21 {strides = array<i32>} : memref<32x128xbf16, #tpu.memory_space<vmem>>, vector<32x128xbf16>,
    } else {
    }
    %c0 = arith.constant 0 : index
    %c0_1 = arith.constant 0 : index
    %3 = vector.load %arg6[%c0, %c0_1] : memref<32x128xbf16, #tpu.memory_space<vmem>>, vector<32x128xbf16>
    %c0_2 = arith.constant 0 : index
    %c0_3 = arith.constant 0 : index
    %4 = vector.load %arg4[%c0_2, %c0_3] : memref<128x256xbf16, #tpu.memory_space<vmem>>, vector<128x256xbf16>
    %cst = arith.constant dense<0.000000e+00> : vector<32x256xf32>
    %5 = tpu.matmul %3, %4, %cst {dimension_numbers = #tpu.dot_dimension_numbers<[1], [0], [0], [1], [0, 0, 1, 1], [], []>} : vector<32x128xbf16>, vector<128x256xbf16>, vector<32x256xf32> -> vector<32x256xf32>
    %c0_4 = arith.constant 0 : index
    %c0_5 = arith.constant 0 : index
    %6 = vector.load %arg5[%c0_4, %c0_5] : memref<32x256xf32, #tpu.memory_space<vmem>>, vector<32x256xf32>
    tpu.vector_store %arg5[%c0_4, %c0_5], %5 {strides = array<i32>} : memref<32x256xf32, #tpu.memory_space<vmem>>, vector<32x256xf32>,
    return
  }
  func.func @transform_0(%arg0: i32, %arg1: i32) -> (i32, i32) {
    %c0_i32 = arith.constant 0 : i32
    %c0_i32_0 = arith.constant 0 : i32
    return %arg0, %c0_i32 : i32, i32
  }
  func.func @transform_1(%arg0: i32, %arg1: i32) -> (i32, i32) {
    %c0_i32 = arith.constant 0 : i32
    %c0_i32_0 = arith.constant 0 : i32
    %c0_i32_1 = arith.constant 0 : i32
    return %c0_i32, %c0_i32_0 : i32, i32
  }
  func.func @transform_2(%arg0: i32, %arg1: i32) -> (i32, i32) {
    %c0_i32 = arith.constant 0 : i32
    %c0_i32_0 = arith.constant 0 : i32
    return %c0_i32, %arg1 : i32, i32
  }
  func.func @transform_3(%arg0: i32, %arg1: i32) -> (i32, i32) {
    %c0_i32 = arith.constant 0 : i32
    return %arg0, %arg1 : i32, i32
  }
}

</mosaic_0001>

<bundles_post_ra>
// kernel: transformer_lm.11
= control target key start
LH: loop header
LB: loop body
LE: loop exit
PB: predicated region body
PF: predicated region fallthrough
CT: control target
= control target key end

     0   :  { %s284_s1 = inlined_call_operand.vmem [shape: bf16[128,128], index: 1, kind: input, shape index: {}]   ;;  %s285_s0 = inlined_call_operand.vmem [shape: bf16[32,128], index: 0, kind: input, shape index: {}]   ;;  %s286_s2 = inlined_call_operand.vmem [shape: f32[32,128], index: 2, kind: input, shape index: {}]   ;;  %s287_s3 = inlined_call_operand.vmem [shape: f32[32,128], index: 3, kind: output, shape index: {}]  }
   0x1   :  { %v200_v0 = vld [vmem:[%s284_s1] sm:$0xff]   ;;  %v201_v1 = vld [vmem:[%s284_s1 + $0x8] sm:$0xff]   ;;  %v202_v2 = vld [vmem:[%s284_s1 + $0x10] sm:$0xff]  }
   0x2   :  { %180 = vmatprep.subr.bf16.mxu0 %v200_v0  ;;  %v203_v3 = vld [vmem:[%s284_s1 + $0x18] sm:$0xff]   ;;  %v208_v4 = vld [vmem:[%s285_s0] sm:$0xff]   ;;  %v205_v6 = vld [vmem:[%s284_s1 + $0x28] sm:$0xff]  }
   0x3   :  { %181 = vmatpush3.bf16.msra.mxu0 %v200_v0  ;;  %196 = vmatprep.mubr.bf16.mxu0 %v208_v4  ;;  %v204_v5 = vld [vmem:[%s284_s1 + $0x20] sm:$0xff]   ;;  %v206_v7 = vld [vmem:[%s284_s1 + $0x30] sm:$0xff]   ;;  %v207_v8 = vld [vmem:[%s284_s1 + $0x38] sm:$0xff]  }
   0x4   :  { %182 = vmatprep.subr.bf16.mxu0 %v201_v1  ;;  %v209_v9 = vld [vmem:[%s285_s0 + $0x8] sm:$0xff]   ;;  %v146_v10 = vld [vmem:[%s286_s2 + $0x10] sm:$0xff]  ;;  %v144_v11 = vld [vmem:[%s286_s2] sm:$0xff] }
   0x5   :  { %v147_v13 = vld [vmem:[%s286_s2 + $0x18] sm:$0xff]  ;;  %v145_v16 = vld [vmem:[%s286_s2 + $0x8] sm:$0xff] }
   0x7   :  { %183 = vmatpush3.bf16.msra.mxu0 %v201_v1 }
   0x8   :  { %184 = vmatprep.subr.bf16.mxu0 %v202_v2 }
   0xb   :  { %185 = vmatpush3.bf16.msra.mxu0 %v202_v2 }
   0xc   :  { %186 = vmatprep.subr.bf16.mxu0 %v203_v3 }
   0xf   :  { %187 = vmatpush3.bf16.msra.mxu0 %v203_v3 }
  0x10   :  { %188 = vmatprep.subr.bf16.mxu0 %v204_v5 }
  0x13   :  { %189 = vmatpush3.bf16.msra.mxu0 %v204_v5 }
  0x14   :  { %190 = vmatprep.subr.bf16.mxu0 %v205_v6 }
  0x17   :  { %191 = vmatpush3.bf16.msra.mxu0 %v205_v6 }
  0x18   :  { %192 = vmatprep.subr.bf16.mxu0 %v206_v7 }
  0x1b   :  { %193 = vmatpush3.bf16.msra.mxu0 %v206_v7 }
  0x1c   :  { %194 = vmatprep.subr.bf16.mxu0 %v207_v8 }
  0x1f   :  { %195 = vmatpush3.bf16.msra.mxu0 %v207_v8 }
  0x22   :  { %197 = vmatmul.mubr.bf16.vlgmr.msra.gmra.mrb[0].mxu0 %v209_v9 }
  0xf5   :  { %v198_v12 = vpop.f32.mrb[0].mxu0 }
  0xf6   :  { %v150_v14 = vadd.f32 %v198_v12, %v146_v10  ;;  %v129_v15 = vpop.f32.mrb[1].mxu0 }
  0xf7   :  { %v148_v17 = vadd.f32 %v144_v11, %v129_v15  ;;  %v199_v18 = vpop.f32.mrb[2].mxu0 }
  0xf8   :  { %154 = vst [vmem:[%s287_s3 + $0x10] sm:$0xff] %v150_v14  ;;  %v151_v19 = vadd.f32 %v199_v18, %v147_v13  ;;  %v132_v20 = vpop.f32.mrb[3].mxu0 }
  0xf9   :  { %152 = vst [vmem:[%s287_s3] sm:$0xff] %v148_v17  ;;  %v149_v21 = vadd.f32 %v145_v16, %v132_v20 }
  0xfa   :  { %155 = vst [vmem:[%s287_s3 + $0x18] sm:$0xff] %v151_v19 }
  0xfb   :  { %153 = vst [vmem:[%s287_s3 + $0x8] sm:$0xff] %v149_v21 }

// kernel: transformer_lm.9
= control target key start
LH: loop header
LB: loop body
LE: loop exit
PB: predicated region body
PF: predicated region fallthrough
CT: control target
= control target key end

     0   :  { %v495_v28 = vmov 0   ;;  %s647_s0 = inlined_call_operand.vmem [shape: f32[32,128], index: 0, kind: input, shape index: {}]   ;;  %s648_s2 = inlined_call_operand.vmem [shape: bf16[128,384], index: 2, kind: input, shape index: {}]   ;;  %s649_s1 = inlined_call_operand.vmem [shape: f32[1,128], index: 1, kind: input, shape index: {}]   ;;  %s650_s3 = inlined_call_operand.vmem [shape: bf16[32,384], index: 3, kind: output, shape index: {}]  }
   0x1   :  { %v519_v0 = vld [vmem:[%s647_s0] sm:$0xff]  ;;  %v524_v1 = vld [vmem:[%s647_s0 + $0x10] sm:$0xff]  ;;  %v529_v2 = vld [vmem:[%s647_s0 + $0x8] sm:$0xff]  ;;  %261 = vmatprep.mubr.bf16.mxu0 %v495_v28 }
   0x2   :  { %v23_v3 = vmul.f32 %v519_v0, %v519_v0  ;;  %v25_v4 = vmul.f32 %v524_v1, %v524_v1  ;;  %v538_v5 = vld [vmem:[%s647_s0 + $0x18] sm:$0xff]  ;;  %v455_v6 = vld [vmem:[%s648_s2 + $0x4] ss:$12 sps:$4 sm:$0xff]   ;;  %v457_v7 = vld [vmem:[%s648_s2] ss:$12 sps:$4 sm:$0xff]   ;;  %v24_v8 = vmul.f32 %v529_v2, %v529_v2 }
   0x3   :  { %v26_v9 = vmul.f32 %v538_v5, %v538_v5  ;;  %v458_v10 = vld [vmem:[%s648_s2 + $0x8] ss:$12 sps:$4 sm:$0xff]   ;;  %229 = vmatprep.subr.bf16.mxu0 %v455_v6  ;;  %v461_v12 = vld [vmem:[%s648_s2 + $0x18] ss:$12 sps:$4 sm:$0xff]   ;;  %v462_v13 = vld [vmem:[%s648_s2 + $0x20] ss:$12 sps:$4 sm:$0xff]  }
   0x4   :  { %27 = vadd.xlane.f32.xlu0 %v23_v3  ;;  %31 = vadd.xlane.f32.xlu1 %v25_v4  ;;  %v459_v11 = vld [vmem:[%s648_s2 + $0x1c] ss:$12 sps:$4 sm:$0xff]   ;;  %v463_v14 = vld [vmem:[%s648_s2 + $0x34] ss:$12 sps:$4 sm:$0xff]   ;;  %v466_v16 = vld [vmem:[%s648_s2 + $0x38] ss:$12 sps:$4 sm:$0xff]  }
   0x5   :  { %230 = vmatpush1.bf16.msra.mxu0 %v457_v7  ;;  %434 = vmatprep.subr.bf16.mxu1 %v458_v10  ;;  %v465_v15 = vld [vmem:[%s648_s2 + $0x30] ss:$12 sps:$4 sm:$0xff]   ;;  %v467_v17 = vld [vmem:[%s648_s2 + $0x4c] ss:$12 sps:$4 sm:$0xff]   ;;  %v469_v18 = vld [vmem:[%s648_s2 + $0x48] ss:$12 sps:$4 sm:$0xff]  }
   0x6   :  { %435 = vmatpush3.bf16.msra.mxu1 %v458_v10  ;;  %231 = vmatprep.subr.bf16.mxu0 %v459_v11  ;;  %v470_v19 = vld [vmem:[%s648_s2 + $0x50] ss:$12 sps:$4 sm:$0xff]   ;;  %v473_v21 = vld [vmem:[%s648_s2 + $0x60] ss:$12 sps:$4 sm:$0xff]   ;;  %v474_v22 = vld [vmem:[%s648_s2 + $0x68] ss:$12 sps:$4 sm:$0xff]  }
   0x7   :  { %436 = vmatprep.subr.bf16.mxu1 %v462_v13  ;;  %v471_v20 = vld [vmem:[%s648_s2 + $0x64] ss:$12 sps:$4 sm:$0xff]   ;;  %v475_v23 = vld [vmem:[%s648_s2 + $0x7c] ss:$12 sps:$4 sm:$0xff]   ;;  %v478_v24 = vld [vmem:[%s648_s2 + $0x80] ss:$12 sps:$4 sm:$0xff]  }
   0x8   :  { %29 = vadd.xlane.f32.xlu0 %v24_v8  ;;  %33 = vadd.xlane.f32.xlu1 %v26_v9  ;;  %v477_v25 = vld [vmem:[%s648_s2 + $0x78] ss:$12 sps:$4 sm:$0xff]   ;;  %v479_v26 = vld [vmem:[%s648_s2 + $0x94] ss:$12 sps:$4 sm:$0xff]   ;;  %v481_v29 = vld [vmem:[%s648_s2 + $0x90] ss:$12 sps:$4 sm:$0xff]  }
   0x9   :  { %232 = vmatpush1.bf16.msra.mxu0 %v461_v12  ;;  %v482_v27 = vld [vmem:[%s648_s2 + $0x98] ss:$12 sps:$4 sm:$0xff]   ;;  %v486_v31 = vld [vmem:[%s648_s2 + $0xb0] ss:$12 sps:$4 sm:$0xff]   ;;  %v485_v32 = vld [vmem:[%s648_s2 + $0xa8] ss:$12 sps:$4 sm:$0xff]  }
   0xa   :  { %437 = vmatpush3.bf16.msra.mxu1 %v462_v13  ;;  %233 = vmatprep.subr.bf16.mxu0 %v463_v14  ;;  %v483_v30 = vld [vmem:[%s648_s2 + $0xac] ss:$12 sps:$4 sm:$0xff]   ;;  %v383_v50 = vld [vmem:[%s649_s1] ss:$0 sm:$0xff] }
   0xb   :  { %438 = vmatprep.subr.bf16.mxu1 %v466_v16 }
   0xd   :  { %234 = vmatpush1.bf16.msra.mxu0 %v465_v15 }
   0xe   :  { %439 = vmatpush3.bf16.msra.mxu1 %v466_v16  ;;  %235 = vmatprep.subr.bf16.mxu0 %v467_v17 }
   0xf   :  { %440 = vmatprep.subr.bf16.mxu1 %v470_v19 }
  0x11   :  { %236 = vmatpush1.bf16.msra.mxu0 %v469_v18 }
  0x12   :  { %441 = vmatpush3.bf16.msra.mxu1 %v470_v19  ;;  %237 = vmatprep.subr.bf16.mxu0 %v471_v20 }
  0x13   :  { %442 = vmatprep.subr.bf16.mxu1 %v474_v22 }
  0x15   :  { %238 = vmatpush1.bf16.msra.mxu0 %v473_v21 }
  0x16   :  { %443 = vmatpush3.bf16.msra.mxu1 %v474_v22  ;;  %239 = vmatprep.subr.bf16.mxu0 %v475_v23 }
  0x17   :  { %444 = vmatprep.subr.bf16.mxu1 %v478_v24 }
  0x19   :  { %240 = vmatpush1.bf16.msra.mxu0 %v477_v25 }
  0x1a   :  { %445 = vmatpush3.bf16.msra.mxu1 %v478_v24  ;;  %241 = vmatprep.subr.bf16.mxu0 %v479_v26 }
  0x1b   :  { %446 = vmatprep.subr.bf16.mxu1 %v482_v27 }
  0x1d   :  { %242 = vmatpush1.bf16.msra.mxu0 %v481_v29 }
  0x1e   :  { %447 = vmatpush3.bf16.msra.mxu1 %v482_v27  ;;  %243 = vmatprep.subr.bf16.mxu0 %v483_v30 }
  0x1f   :  { %448 = vmatprep.subr.bf16.mxu1 %v486_v31 }
  0x21   :  { %244 = vmatpush1.bf16.msra.mxu0 %v485_v32 }
  0x22   :  { %449 = vmatpush3.bf16.msra.mxu1 %v486_v31 }
  0x91   :  { %v28_v33 = vpop.xlane.xlu0 %27  ;;  %v32_v34 = vpop.xlane.xlu1 %31 }
  0x92   :  { %v36_v35 = vmul.f32 0.0078125, %v28_v33  ;;  %v38_v36 = vmul.f32 0.0078125, %v32_v34 }
  0x94   :  { %v40_v37 = vadd.f32 1e-05, %v36_v35  ;;  %v42_v38 = vadd.f32 1e-05, %v38_v36 }
  0x95   :  { %v30_v39 = vpop.xlane.xlu0 %29  ;;  %v34_v40 = vpop.xlane.xlu1 %33 }
  0x96   :  { %487 = vrsqrt.f32 %v40_v37  ;;  %v37_v41 = vmul.f32 0.0078125, %v30_v39  ;;  %v39_v42 = vmul.f32 0.0078125, %v34_v40 }
  0x97   :  { %489 = vrsqrt.f32 %v42_v38 }
  0x98   :  { %v41_v43 = vadd.f32 1e-05, %v37_v41  ;;  %v43_v44 = vadd.f32 1e-05, %v39_v42 }
  0x9a   :  { %491 = vrsqrt.f32 %v41_v43 }
  0x9b   :  { %493 = vrsqrt.f32 %v43_v44 }
  0xa0   :  { %v488_v45 = vpop.eup %487 }
  0xa1   :  { %v490_v46 = vpop.eup %489  ;;  %v48_v48 = vmul.f32 %v488_v45, %v519_v0 }
  0xa2   :  { %v50_v47 = vmul.f32 %v490_v46, %v524_v1 }
  0xa3   :  { %v59_v55 = vmul.f32 %v383_v50, %v48_v48 }
  0xa4   :  { %v492_v49 = vpop.eup %491  ;;  %v61_v54 = vmul.f32 %v383_v50, %v50_v47 }
  0xa5   :  { %v494_v51 = vpop.eup %493  ;;  %v49_v52 = vmul.f32 %v492_v49, %v529_v2 }
  0xa6   :  { %v51_v53 = vmul.f32 %v494_v51, %v538_v5 }
  0xa7   :  { %v60_v56 = vmul.f32 %v383_v50, %v49_v52 }
  0xa8   :  { %v62_v57 = vmul.f32 %v383_v50, %v51_v53 }
  0xa9   :  { %v63_v58 = vpack.c.bf16 %v60_v56, %v59_v55 }
  0xaa   :  { %v64_v59 = vpack.c.bf16 %v62_v57, %v61_v54 }
  0xab   :  { %262 = vmatmul.mubr.bf16.vlgmr.msra.gmra.mrb[0].mxu0 %v63_v58  ;;  %450 = vmatprep.mubr.bf16.mxu1 %v63_v58 }
  0xac   :  { %451 = vmatmul.mubr.bf16.vlgmr.msra.gmra.mrb[0].mxu1 %v64_v59  ;;  %271 = vmatprep.mubr.bf16.mxu0 %v495_v28 }
  0xb3   :  { %272 = vmatmul.mubr.bf16.gmra.mrb[4].mxu0 %v64_v59 }
 0x17e   :  { %v263_v60 = vpop.f32.mrb[0].mxu0 }
 0x17f   :  { %v265_v61 = vpop.f32.mrb[1].mxu0  ;;  %v452_v62 = vpop.f32.mrb[0].mxu1 }
 0x180   :  { %v416_v63 = vpack.c.bf16 %v265_v61, %v263_v60  ;;  %v421_v0 = vpack.c.bf16 %v452_v62, %v452_v62  ;;  %v267_v1 = vpop.f32.mrb[2].mxu0  ;;  %v316_v2 = vpop.f32.mrb[1].mxu1 }
 0x181   :  { %v417_v3 = vpack.c.bf16 %v316_v2, %v316_v2  ;;  %v269_v4 = vpop.f32.mrb[3].mxu0  ;;  %v453_v5 = vpop.f32.mrb[2].mxu1 }
 0x182   :  { %371 = vst [vmem:[%s650_s3] sm:$0xff] %v416_v63  ;;  %376 = vst [vmem:[%s650_s3 + $0x20] sm:$0xf] %v421_v0  ;;  %v418_v6 = vpack.c.bf16 %v269_v4, %v267_v1  ;;  %v423_v7 = vpack.c.bf16 %v453_v5, %v453_v5  ;;  %v319_v8 = vpop.f32.mrb[3].mxu1 }
 0x183   :  { %372 = vst [vmem:[%s650_s3 + $0x8] sm:$0xf] %v417_v3  ;;  %v419_v9 = vpack.c.bf16 %v319_v8, %v319_v8 }
 0x184   :  { %373 = vst [vmem:[%s650_s3 + $0xc] sm:$0xff] %v418_v6  ;;  %378 = vst [vmem:[%s650_s3 + $0x2c] sm:$0xf] %v423_v7 }
 0x185   :  { %374 = vst [vmem:[%s650_s3 + $0x14] sm:$0xf] %v419_v9 }
 0x186   :  { %v273_v10 = vpop.f32.mrb[4].mxu0 }
 0x187   :  { %v275_v11 = vpop.f32.mrb[5].mxu0 }
 0x188   :  { %v420_v12 = vpack.c.bf16 %v275_v11, %v273_v10  ;;  %v277_v13 = vpop.f32.mrb[6].mxu0 }
 0x189   :  { %v279_v14 = vpop.f32.mrb[7].mxu0 }
 0x18a   :  { %375 = vst [vmem:[%s650_s3 + $0x18] sm:$0xff] %v420_v12  ;;  %v422_v15 = vpack.c.bf16 %v279_v14, %v277_v13 }
 0x18c   :  { %377 = vst [vmem:[%s650_s3 + $0x24] sm:$0xff] %v422_v15 }

// kernel: transformer_lm.12
= control target key start
LH: loop header
LB: loop body
LE: loop exit
PB: predicated region body
PF: predicated region fallthrough
CT: control target
= control target key end

     0   :  { %v844_v38 = vmov 0   ;;  %s1070_s0 = inlined_call_operand.vmem [shape: f32[32,128], index: 0, kind: input, shape index: {}]   ;;  %s1071_s2 = inlined_call_operand.vmem [shape: bf16[128,256], index: 2, kind: input, shape index: {}]   ;;  %s1072_s3 = inlined_call_operand.vmem [shape: bf16[128,256], index: 3, kind: input, shape index: {}]   ;;  %s1073_s1 = inlined_call_operand.vmem [shape: f32[1,128], index: 1, kind: input, shape index: {}]   ;;  %s1074_s4 = inlined_call_operand.vmem [shape: bf16[256,128], index: 4, kind: input, shape index: {}]   ;;  %s1075_s5 = inlined_call_operand.vmem [shape: f32[32,128], index: 5, kind: output, shape index: {}]  }
   0x1   :  { %v878_v0 = vld [vmem:[%s1070_s0] sm:$0xff]  ;;  %v883_v1 = vld [vmem:[%s1070_s0 + $0x10] sm:$0xff]  ;;  %v888_v2 = vld [vmem:[%s1070_s0 + $0x8] sm:$0xff]  ;;  %207 = vmatprep.mubr.bf16.mxu0 %v844_v38  ;;  %356 = vmatprep.mubr.bf16.mxu1 %v844_v38 }
   0x2   :  { %v29_v3 = vmul.f32 %v878_v0, %v878_v0  ;;  %v31_v4 = vmul.f32 %v883_v1, %v883_v1  ;;  %v897_v5 = vld [vmem:[%s1070_s0 + $0x18] sm:$0xff]  ;;  %v740_v6 = vld [vmem:[%s1071_s2 + $0x4] ss:$8 sps:$4 sm:$0xff]   ;;  %v30_v7 = vmul.f32 %v888_v2, %v888_v2  ;;  %v744_v10 = vld [vmem:[%s1071_s2] ss:$8 sps:$4 sm:$0xff]  }
   0x3   :  { %v32_v8 = vmul.f32 %v897_v5, %v897_v5  ;;  %v742_v9 = vld [vmem:[%s1072_s3 + $0x4] ss:$8 sps:$4 sm:$0xff]   ;;  %v745_v11 = vld [vmem:[%s1072_s3] ss:$8 sps:$4 sm:$0xff]   ;;  %175 = vmatprep.subr.bf16.mxu0 %v740_v6  ;;  %v746_v12 = vld [vmem:[%s1071_s2 + $0x14] ss:$8 sps:$4 sm:$0xff]  }
   0x4   :  { %33 = vadd.xlane.f32.xlu0 %v29_v3  ;;  %37 = vadd.xlane.f32.xlu1 %v31_v4  ;;  %v748_v13 = vld [vmem:[%s1072_s3 + $0x14] ss:$8 sps:$4 sm:$0xff]   ;;  %v750_v14 = vld [vmem:[%s1071_s2 + $0x10] ss:$8 sps:$4 sm:$0xff]   ;;  %v752_v16 = vld [vmem:[%s1071_s2 + $0x24] ss:$8 sps:$4 sm:$0xff]  }
   0x5   :  { %324 = vmatprep.subr.bf16.mxu1 %v742_v9  ;;  %176 = vmatpush1.bf16.msra.mxu0 %v744_v10  ;;  %v751_v15 = vld [vmem:[%s1072_s3 + $0x10] ss:$8 sps:$4 sm:$0xff]   ;;  %v754_v17 = vld [vmem:[%s1072_s3 + $0x24] ss:$8 sps:$4 sm:$0xff]   ;;  %v756_v18 = vld [vmem:[%s1071_s2 + $0x20] ss:$8 sps:$4 sm:$0xff]  }
   0x6   :  { %325 = vmatpush1.bf16.msra.mxu1 %v745_v11  ;;  %177 = vmatprep.subr.bf16.mxu0 %v746_v12  ;;  %v757_v19 = vld [vmem:[%s1072_s3 + $0x20] ss:$8 sps:$4 sm:$0xff]   ;;  %v758_v20 = vld [vmem:[%s1071_s2 + $0x34] ss:$8 sps:$4 sm:$0xff]   ;;  %v762_v22 = vld [vmem:[%s1071_s2 + $0x30] ss:$8 sps:$4 sm:$0xff]  }
   0x7   :  { %326 = vmatprep.subr.bf16.mxu1 %v748_v13  ;;  %v760_v21 = vld [vmem:[%s1072_s3 + $0x34] ss:$8 sps:$4 sm:$0xff]   ;;  %v763_v23 = vld [vmem:[%s1072_s3 + $0x30] ss:$8 sps:$4 sm:$0xff]   ;;  %v764_v24 = vld [vmem:[%s1071_s2 + $0x44] ss:$8 sps:$4 sm:$0xff]  }
   0x8   :  { %35 = vadd.xlane.f32.xlu0 %v30_v7  ;;  %39 = vadd.xlane.f32.xlu1 %v32_v8  ;;  %v766_v25 = vld [vmem:[%s1072_s3 + $0x44] ss:$8 sps:$4 sm:$0xff]   ;;  %v768_v26 = vld [vmem:[%s1071_s2 + $0x40] ss:$8 sps:$4 sm:$0xff]   ;;  %v770_v28 = vld [vmem:[%s1071_s2 + $0x54] ss:$8 sps:$4 sm:$0xff]  }
   0x9   :  { %178 = vmatpush1.bf16.msra.mxu0 %v750_v14  ;;  %v769_v27 = vld [vmem:[%s1072_s3 + $0x40] ss:$8 sps:$4 sm:$0xff]   ;;  %v772_v29 = vld [vmem:[%s1072_s3 + $0x54] ss:$8 sps:$4 sm:$0xff]   ;;  %v774_v30 = vld [vmem:[%s1071_s2 + $0x50] ss:$8 sps:$4 sm:$0xff]  }
   0xa   :  { %327 = vmatpush1.bf16.msra.mxu1 %v751_v15  ;;  %179 = vmatprep.subr.bf16.mxu0 %v752_v16  ;;  %v775_v31 = vld [vmem:[%s1072_s3 + $0x50] ss:$8 sps:$4 sm:$0xff]   ;;  %v776_v32 = vld [vmem:[%s1071_s2 + $0x64] ss:$8 sps:$4 sm:$0xff]   ;;  %v780_v34 = vld [vmem:[%s1071_s2 + $0x60] ss:$8 sps:$4 sm:$0xff]  }
   0xb   :  { %328 = vmatprep.subr.bf16.mxu1 %v754_v17  ;;  %v778_v33 = vld [vmem:[%s1072_s3 + $0x64] ss:$8 sps:$4 sm:$0xff]   ;;  %v781_v35 = vld [vmem:[%s1072_s3 + $0x60] ss:$8 sps:$4 sm:$0xff]   ;;  %v782_v36 = vld [vmem:[%s1071_s2 + $0x74] ss:$8 sps:$4 sm:$0xff]  }
   0xc   :  { %v784_v37 = vld [vmem:[%s1072_s3 + $0x74] ss:$8 sps:$4 sm:$0xff]   ;;  %v786_v39 = vld [vmem:[%s1071_s2 + $0x70] ss:$8 sps:$4 sm:$0xff]   ;;  %v638_v56 = vld [vmem:[%s1073_s1] ss:$0 sm:$0xff] }
   0xd   :  { %180 = vmatpush1.bf16.msra.mxu0 %v756_v18  ;;  %v787_v40 = vld [vmem:[%s1072_s3 + $0x70] ss:$8 sps:$4 sm:$0xff]   ;;  %v788_v8 = vld [vmem:[%s1074_s4 + $0x40] sm:$0xff]   ;;  %v790_v10 = vld [vmem:[%s1074_s4 + $0x48] sm:$0xff]  }
   0xe   :  { %329 = vmatpush1.bf16.msra.mxu1 %v757_v19  ;;  %181 = vmatprep.subr.bf16.mxu0 %v758_v20  ;;  %v789_v9 = vld [vmem:[%s1074_s4] sm:$0xff]   ;;  %v791_v11 = vld [vmem:[%s1074_s4 + $0x8] sm:$0xff]   ;;  %v792_v12 = vld [vmem:[%s1074_s4 + $0x50] sm:$0xff]  }
   0xf   :  { %330 = vmatprep.subr.bf16.mxu1 %v760_v21  ;;  %v793_v13 = vld [vmem:[%s1074_s4 + $0x10] sm:$0xff]   ;;  %v794_v14 = vld [vmem:[%s1074_s4 + $0x58] sm:$0xff]   ;;  %v796_v16 = vld [vmem:[%s1074_s4 + $0x60] sm:$0xff]  }
  0x10   :  { %v795_v15 = vld [vmem:[%s1074_s4 + $0x18] sm:$0xff]   ;;  %v797_v17 = vld [vmem:[%s1074_s4 + $0x20] sm:$0xff]   ;;  %v798_v18 = vld [vmem:[%s1074_s4 + $0x68] sm:$0xff]  }
  0x11   :  { %182 = vmatpush1.bf16.msra.mxu0 %v762_v22  ;;  %v799_v19 = vld [vmem:[%s1074_s4 + $0x28] sm:$0xff]   ;;  %v800_v20 = vld [vmem:[%s1074_s4 + $0x70] sm:$0xff]   ;;  %v802_v22 = vld [vmem:[%s1074_s4 + $0x78] sm:$0xff]  }
  0x12   :  { %331 = vmatpush1.bf16.msra.mxu1 %v763_v23  ;;  %183 = vmatprep.subr.bf16.mxu0 %v764_v24  ;;  %v801_v21 = vld [vmem:[%s1074_s4 + $0x30] sm:$0xff]   ;;  %v803_v23 = vld [vmem:[%s1074_s4 + $0x38] sm:$0xff]  }
  0x13   :  { %332 = vmatprep.subr.bf16.mxu1 %v766_v25 }
  0x15   :  { %184 = vmatpush1.bf16.msra.mxu0 %v768_v26 }
  0x16   :  { %333 = vmatpush1.bf16.msra.mxu1 %v769_v27  ;;  %185 = vmatprep.subr.bf16.mxu0 %v770_v28 }
  0x17   :  { %334 = vmatprep.subr.bf16.mxu1 %v772_v29 }
  0x19   :  { %186 = vmatpush1.bf16.msra.mxu0 %v774_v30 }
  0x1a   :  { %335 = vmatpush1.bf16.msra.mxu1 %v775_v31  ;;  %187 = vmatprep.subr.bf16.mxu0 %v776_v32 }
  0x1b   :  { %336 = vmatprep.subr.bf16.mxu1 %v778_v33 }
  0x1d   :  { %188 = vmatpush1.bf16.msra.mxu0 %v780_v34 }
  0x1e   :  { %337 = vmatpush1.bf16.msra.mxu1 %v781_v35  ;;  %189 = vmatprep.subr.bf16.mxu0 %v782_v36 }
  0x1f   :  { %338 = vmatprep.subr.bf16.mxu1 %v784_v37 }
  0x21   :  { %190 = vmatpush1.bf16.msra.mxu0 %v786_v39 }
  0x22   :  { %339 = vmatpush1.bf16.msra.mxu1 %v787_v40  ;;  %695 = vmatprep.subr.bf16.mxu0 %v788_v8 }
  0x23   :  { %723 = vmatprep.subr.bf16.mxu1 %v788_v8 }
  0x91   :  { %v34_v41 = vpop.xlane.xlu0 %33  ;;  %v38_v42 = vpop.xlane.xlu1 %37 }
  0x92   :  { %v42_v43 = vmul.f32 0.0078125, %v34_v41  ;;  %v44_v44 = vmul.f32 0.0078125, %v38_v42 }
  0x94   :  { %v46_v45 = vadd.f32 1e-05, %v42_v43  ;;  %v48_v50 = vadd.f32 1e-05, %v44_v44 }
  0x95   :  { %v36_v46 = vpop.xlane.xlu0 %35  ;;  %v40_v47 = vpop.xlane.xlu1 %39 }
  0x96   :  { %804 = vrsqrt.f32 %v46_v45  ;;  %v43_v48 = vmul.f32 0.0078125, %v36_v46  ;;  %v45_v49 = vmul.f32 0.0078125, %v40_v47 }
  0x98   :  { %v47_v51 = vadd.f32 1e-05, %v43_v48  ;;  %v49_v52 = vadd.f32 1e-05, %v45_v49 }
  0x9a   :  { %806 = vrsqrt.f32 %v47_v51 }
  0x9b   :  { %808 = vrsqrt.f32 %v48_v50 }
  0x9c   :  { %810 = vrsqrt.f32 %v49_v52 }
  0xa0   :  { %v805_v53 = vpop.eup %804 }
  0xa1   :  { %v54_v54 = vmul.f32 %v805_v53, %v878_v0 }
  0xa3   :  { %v65_v60 = vmul.f32 %v638_v56, %v54_v54 }
  0xa4   :  { %v807_v55 = vpop.eup %806 }
  0xa5   :  { %v809_v57 = vpop.eup %808  ;;  %v55_v58 = vmul.f32 %v807_v55, %v888_v2 }
  0xa6   :  { %v811_v59 = vpop.eup %810  ;;  %v56_v63 = vmul.f32 %v809_v57, %v883_v1 }
  0xa7   :  { %v66_v61 = vmul.f32 %v638_v56, %v55_v58  ;;  %v57_v3 = vmul.f32 %v811_v59, %v897_v5 }
  0xa8   :  { %v67_v4 = vmul.f32 %v638_v56, %v56_v63 }
  0xa9   :  { %v69_v62 = vpack.c.bf16 %v66_v61, %v65_v60  ;;  %v68_v6 = vmul.f32 %v638_v56, %v57_v3 }
  0xab   :  { %208 = vmatmul.mubr.bf16.vlgmr.msra.gmra.mrb[0].mxu0 %v69_v62  ;;  %357 = vmatmul.mubr.bf16.vlgmr.msra.gmra.mrb[0].mxu1 %v69_v62  ;;  %v70_v7 = vpack.c.bf16 %v68_v6, %v67_v4 }
  0xac   :  { %217 = vmatprep.mubr.bf16.mxu0 %v844_v38  ;;  %366 = vmatprep.mubr.bf16.mxu1 %v844_v38 }
  0xad   :  { %696 = vmatpush3.bf16.msra.mxu0 %v789_v9  ;;  %731 = vmatpush3.bf16.msra.mxu1 %v789_v9 }
  0xae   :  { %697 = vmatprep.subr.bf16.mxu0 %v790_v10  ;;  %724 = vmatprep.subr.bf16.mxu1 %v790_v10 }
  0xb1   :  { %698 = vmatpush3.bf16.msra.mxu0 %v791_v11  ;;  %732 = vmatpush3.bf16.msra.mxu1 %v791_v11 }
  0xb2   :  { %699 = vmatprep.subr.bf16.mxu0 %v792_v12  ;;  %725 = vmatprep.subr.bf16.mxu1 %v792_v12 }
  0xb3   :  { %218 = vmatmul.mubr.bf16.gmra.mrb[4].mxu0 %v70_v7  ;;  %367 = vmatmul.mubr.bf16.gmra.mrb[4].mxu1 %v70_v7 }
  0xb5   :  { %700 = vmatpush3.bf16.msra.mxu0 %v793_v13  ;;  %733 = vmatpush3.bf16.msra.mxu1 %v793_v13 }
  0xb6   :  { %701 = vmatprep.subr.bf16.mxu0 %v794_v14  ;;  %726 = vmatprep.subr.bf16.mxu1 %v794_v14 }
  0xb9   :  { %702 = vmatpush3.bf16.msra.mxu0 %v795_v15  ;;  %734 = vmatpush3.bf16.msra.mxu1 %v795_v15 }
  0xba   :  { %703 = vmatprep.subr.bf16.mxu0 %v796_v16  ;;  %727 = vmatprep.subr.bf16.mxu1 %v796_v16 }
  0xbd   :  { %704 = vmatpush3.bf16.msra.mxu0 %v797_v17  ;;  %735 = vmatpush3.bf16.msra.mxu1 %v797_v17 }
  0xbe   :  { %705 = vmatprep.subr.bf16.mxu0 %v798_v18  ;;  %728 = vmatprep.subr.bf16.mxu1 %v798_v18 }
  0xc1   :  { %706 = vmatpush3.bf16.msra.mxu0 %v799_v19  ;;  %736 = vmatpush3.bf16.msra.mxu1 %v799_v19 }
  0xc2   :  { %707 = vmatprep.subr.bf16.mxu0 %v800_v20  ;;  %729 = vmatprep.subr.bf16.mxu1 %v800_v20 }
  0xc5   :  { %708 = vmatpush3.bf16.msra.mxu0 %v801_v21  ;;  %737 = vmatpush3.bf16.msra.mxu1 %v801_v21 }
  0xc6   :  { %709 = vmatprep.subr.bf16.mxu0 %v802_v22  ;;  %730 = vmatprep.subr.bf16.mxu1 %v802_v22 }
  0xc9   :  { %710 = vmatpush3.bf16.msra.mxu0 %v803_v23  ;;  %738 = vmatpush3.bf16.msra.mxu1 %v803_v23 }
 0x17e   :  { %v209_v24 = vpop.f32.mrb[0].mxu0  ;;  %v358_v25 = vpop.f32.mrb[0].mxu1 }
 0x17f   :  { %v671_v26 = vmul.f32 -1.442695, %v209_v24  ;;  %v211_v27 = vpop.f32.mrb[1].mxu0  ;;  %v360_v28 = vpop.f32.mrb[1].mxu1 }
 0x180   :  { %v672_v29 = vmul.f32 -1.442695, %v211_v27  ;;  %v213_v30 = vpop.f32.mrb[2].mxu0  ;;  %v362_v31 = vpop.f32.mrb[2].mxu1 }
 0x181   :  { %812 = vpow2.f32 %v671_v26  ;;  %v673_v32 = vmul.f32 -1.442695, %v213_v30  ;;  %v215_v33 = vpop.f32.mrb[3].mxu0  ;;  %v364_v34 = vpop.f32.mrb[3].mxu1 }
 0x182   :  { %814 = vpow2.f32 %v672_v29  ;;  %v674_v35 = vmul.f32 -1.442695, %v215_v33 }
 0x183   :  { %816 = vpow2.f32 %v673_v32 }
 0x184   :  { %818 = vpow2.f32 %v674_v35 }
 0x186   :  { %v219_v36 = vpop.f32.mrb[4].mxu0  ;;  %v368_v37 = vpop.f32.mrb[4].mxu1 }
 0x187   :  { %v675_v38 = vmul.f32 -1.442695, %v219_v36  ;;  %v221_v39 = vpop.f32.mrb[5].mxu0  ;;  %v370_v40 = vpop.f32.mrb[5].mxu1 }
 0x188   :  { %v676_v41 = vmul.f32 -1.442695, %v221_v39  ;;  %v223_v42 = vpop.f32.mrb[6].mxu0  ;;  %v372_v43 = vpop.f32.mrb[6].mxu1 }
 0x189   :  { %820 = vpow2.f32 %v675_v38  ;;  %v677_v44 = vmul.f32 -1.442695, %v223_v42  ;;  %v225_v45 = vpop.f32.mrb[7].mxu0  ;;  %v374_v46 = vpop.f32.mrb[7].mxu1 }
 0x18a   :  { %822 = vpow2.f32 %v676_v41  ;;  %v678_v47 = vmul.f32 -1.442695, %v225_v45 }
 0x18b   :  { %v813_v48 = vpop.eup %812  ;;  %824 = vpow2.f32 %v677_v44 }
 0x18c   :  { %v815_v49 = vpop.eup %814  ;;  %v401_v50 = vadd.f32 1.0, %v813_v48  ;;  %826 = vpow2.f32 %v678_v47 }
 0x18d   :  { %v817_v51 = vpop.eup %816  ;;  %v402_v52 = vadd.f32 1.0, %v815_v49 }
 0x18e   :  { %v819_v53 = vpop.eup %818  ;;  %828 = vrcp.f32 %v401_v50  ;;  %v403_v54 = vadd.f32 1.0, %v817_v51 }
 0x18f   :  { %830 = vrcp.f32 %v402_v52  ;;  %v404_v55 = vadd.f32 1.0, %v819_v53 }
 0x190   :  { %832 = vrcp.f32 %v403_v54 }
 0x191   :  { %834 = vrcp.f32 %v404_v55 }
 0x193   :  { %v821_v56 = vpop.eup %820 }
 0x194   :  { %v823_v57 = vpop.eup %822  ;;  %v405_v58 = vadd.f32 1.0, %v821_v56 }
 0x195   :  { %v825_v59 = vpop.eup %824  ;;  %v406_v60 = vadd.f32 1.0, %v823_v57 }
 0x196   :  { %v827_v61 = vpop.eup %826  ;;  %836 = vrcp.f32 %v405_v58  ;;  %v407_v62 = vadd.f32 1.0, %v825_v59 }
 0x197   :  { %838 = vrcp.f32 %v406_v60  ;;  %v408_v63 = vadd.f32 1.0, %v827_v61 }
 0x198   :  { %v829_v3 = vpop.eup %828  ;;  %840 = vrcp.f32 %v407_v62 }
 0x199   :  { %v831_v4 = vpop.eup %830  ;;  %v425_v6 = vmul.f32 %v829_v3, %v209_v24  ;;  %842 = vrcp.f32 %v408_v63 }
 0x19a   :  { %v833_v7 = vpop.eup %832  ;;  %v426_v8 = vmul.f32 %v831_v4, %v211_v27 }
 0x19b   :  { %v835_v9 = vpop.eup %834  ;;  %v433_v10 = vmul.f32 %v425_v6, %v358_v25  ;;  %v427_v11 = vmul.f32 %v833_v7, %v213_v30 }
 0x19c   :  { %v434_v12 = vmul.f32 %v426_v8, %v360_v28  ;;  %v428_v13 = vmul.f32 %v835_v9, %v215_v33 }
 0x19d   :  { %v435_v14 = vmul.f32 %v427_v11, %v362_v31 }
 0x19e   :  { %v436_v15 = vmul.f32 %v428_v13, %v364_v34 }
 0x19f   :  { %v441_v16 = vpack.c.bf16 %v435_v14, %v433_v10 }
 0x1a0   :  { %v837_v17 = vpop.eup %836  ;;  %v442_v18 = vpack.c.bf16 %v436_v15, %v434_v12 }
 0x1a1   :  { %v839_v19 = vpop.eup %838  ;;  %v429_v20 = vmul.f32 %v837_v17, %v219_v36 }
 0x1a2   :  { %v841_v21 = vpop.eup %840  ;;  %v430_v22 = vmul.f32 %v839_v19, %v221_v39  ;;  %609 = vmatprep.mubr.bf16.mxu0 %v442_v18 }
 0x1a3   :  { %v843_v23 = vpop.eup %842  ;;  %v437_v24 = vmul.f32 %v429_v20, %v368_v37  ;;  %v431_v26 = vmul.f32 %v841_v21, %v223_v42  ;;  %610 = vmatmul.mubr.bf16.vlgmr.msra.gmra.mrb[8].mxu0 %v441_v16 }
 0x1a4   :  { %v438_v27 = vmul.f32 %v430_v22, %v370_v40  ;;  %v432_v29 = vmul.f32 %v843_v23, %v225_v45 }
 0x1a5   :  { %v439_v25 = vmul.f32 %v431_v26, %v372_v43 }
 0x1a6   :  { %v440_v30 = vmul.f32 %v432_v29, %v374_v46 }
 0x1a7   :  { %v443_v28 = vpack.c.bf16 %v439_v25, %v437_v24 }
 0x1a8   :  { %v444_v32 = vpack.c.bf16 %v440_v30, %v438_v27 }
 0x1aa   :  { %617 = vmatprep.mubr.bf16.mxu1 %v444_v32 }
 0x1ab   :  { %618 = vmatmul.mubr.bf16.vlgmr.msra.gmra.mrb[8].mxu1 %v443_v28 }
 0x276   :  { %v711_v31 = vpop.f32.mrb[8].mxu0 }
 0x277   :  { %v712_v33 = vpop.f32.mrb[9].mxu0 }
 0x278   :  { %v713_v34 = vadd.f32 %v712_v33, %v711_v31  ;;  %v714_v35 = vpop.f32.mrb[10].mxu0 }
 0x279   :  { %v715_v36 = vpop.f32.mrb[11].mxu0 }
 0x27a   :  { %v626_v38 = vadd.f32 %v713_v34, %v878_v0  ;;  %v716_v39 = vadd.f32 %v715_v36, %v714_v35 }
 0x27c   :  { %630 = vst [vmem:[%s1075_s5] sm:$0xff] %v626_v38  ;;  %v627_v37 = vadd.f32 %v716_v39, %v888_v2 }
 0x27e   :  { %631 = vst [vmem:[%s1075_s5 + $0x8] sm:$0xff] %v627_v37  ;;  %v717_v40 = vpop.f32.mrb[8].mxu1 }
 0x27f   :  { %v718_v41 = vpop.f32.mrb[9].mxu1 }
 0x280   :  { %v719_v42 = vadd.f32 %v718_v41, %v717_v40  ;;  %v720_v43 = vpop.f32.mrb[10].mxu1 }
 0x281   :  { %v721_v44 = vpop.f32.mrb[11].mxu1 }
 0x282   :  { %v628_v45 = vadd.f32 %v719_v42, %v883_v1  ;;  %v722_v46 = vadd.f32 %v721_v44, %v720_v43 }
 0x284   :  { %632 = vst [vmem:[%s1075_s5 + $0x10] sm:$0xff] %v628_v45  ;;  %v629_v0 = vadd.f32 %v722_v46, %v897_v5 }
 0x286   :  { %633 = vst [vmem:[%s1075_s5 + $0x18] sm:$0xff] %v629_v0 }

// kernel: transformer_lm.10
= control target key start
LH: loop header
LB: loop body
LE: loop exit
PB: predicated region body
PF: predicated region fallthrough
CT: control target
= control target key end

     0   :  { %s1798_s12 = smov 0   ;;  %s1800_s13 = smov 0   ;;  %s2198_s0 = inlined_call_operand.vmem [shape: bf16[2,16,384], index: 0, kind: input, shape index: {}, may-alias: {0,1,2}]   ;;  %s2199_s1 = inlined_call_operand.vmem [shape: bf16[2,16,384], index: 1, kind: input, shape index: {}, may-alias: {0,1,2}]   ;;  %s2200_s2 = inlined_call_operand.vmem [shape: bf16[2,16,384], index: 2, kind: input, shape index: {}, may-alias: {0,1,2}]   ;;  %s2201_s3 = inlined_call_operand.vmem [shape: bf16[2,16,128], index: 3, kind: output, shape index: {}]  }
   0x1   :  { %s1802_s14 = smov 0   ;;  %s1804_s15 = smov 0  }
   0x2   :  { %s1806_s16 = smov 0  }
   0x3 LB: > { %s32_s17 = sadd.s32 1, %s1765_s15  ;;  %p48_p1 = scmp.ne.s32.totalorder %s1757_s13, %s1753_s12  ;;  %s1769_s16 = sphi %s1806_s16, %s13_s16   ;;  %s1765_s15 = sphi %s1804_s15, %s2206_s15   ;;  %s1761_s14 = sphi %s1802_s14, %s2205_s14   ;;  %s1757_s13 = sphi %s1800_s13, %s2204_s13   ;;  %s1753_s12 = sphi %s1798_s12, %s2203_s12  }
   0x4   : > { %p34_p0 = scmp.ge.s32.totalorder %s32_s17, 2  ;;  %p49_p2 = scmp.eq.s32.totalorder %s1769_s16, 0 }
   0x5   : > { %s41_s20 = sadd.s32 1, %s1757_s13  ;;  %p1501_p5 = scmp.ge.s32.totalorder %s1769_s16, 2 }
   0x6   : > { %s2208_s17 = smov (%p34_p0, %s32_s17), 0  ;;  %p1829_p3 = por %p49_p2, %p48_p1 }
   0x7   : > { %s36_s19 = ssub.s32 %s1765_s15, %s2208_s17  ;;  %166 = sbr.rel (%p1501_p5) target bundleno = 35 (0x23), region = 16 }
   0x8   : > { %p39_p4 = scmp.eq.s32.totalorder %s36_s19, 0 }
   0xa   : > { %s1837_s21 = scalar_select %p39_p4, %s1757_s13, %s41_s20  }
   0xe   : > { %169 = sbr.rel (!%p1829_p3) target bundleno = 21 (0x15), region = 20  ;;  %s171_s22 = sand.u32 (%p1829_p3), 1, %s1757_s13  }
   0xf   : > { %s1621_s23 = smul.u32 (%p1829_p3), 24, %s1765_s15  ;;  %s1502_s24 = sshll.u32 (%p1829_p3), %s171_s22, 3 }
  0x10   : > { %s173_s28 = scalar_lea.vmem (%p1829_p3), [#allocation5], %s1502_s24 }
  0x11   : > { %s179_s27 = scalar_lea.vmem (%p1829_p3), %s2198_s0, %s1621_s23 }
  0x12   : > { %v195_v0 = vld [vmem:[%s179_s27] sm:$0xf] (%p1829_p3)  ;;  %v197_v1 = vld [vmem:[%s179_s27 + $0xc] sm:$0xf] (%p1829_p3) }
  0x13   : > { %196 = vst [vmem:[%s173_s28] sm:$0xf] (%p1829_p3), %v195_v0  ;;  %198 = vst [vmem:[%s173_s28 + $0x4] sm:$0xf] (%p1829_p3), %v197_v1 }
  0x15 PF: > { %225 = sbr.rel (!%p1829_p3) target bundleno = 28 (0x1c), region = 61  ;;  %s227_s29 = sand.u32 (%p1829_p3), 1, %s1757_s13  }
  0x16   : > { %s1505_s30 = smul.u32 (%p1829_p3), 24, %s1765_s15  ;;  %s1504_s4 = sshll.u32 (%p1829_p3), %s227_s29, 3 }
  0x17   : > { %s229_s8 = scalar_lea.vmem (%p1829_p3), [#allocation6], %s1504_s4 }
  0x18   : > { %s1404_s7 = scalar_lea.vmem (%p1829_p3), %s2199_s1, %s1505_s30 }
  0x19   : > { %v1506_v2 = vld [vmem:[%s1404_s7 + $0x4] sm:$0xf] (%p1829_p3)  ;;  %v1507_v3 = vld [vmem:[%s1404_s7 + $0x10] sm:$0xf] (%p1829_p3) }
  0x1a   : > { %255 = vst [vmem:[%s229_s8] sm:$0xf] (%p1829_p3), %v1506_v2  ;;  %257 = vst [vmem:[%s229_s8 + $0x4] sm:$0xf] (%p1829_p3), %v1507_v3 }
  0x1c PF: > { %284 = sbr.rel (!%p1829_p3) target bundleno = 35 (0x23), region = 102  ;;  %s286_s9 = sand.u32 (%p1829_p3), 1, %s1757_s13  }
  0x1d   : > { %s1509_s10 = smul.u32 (%p1829_p3), 24, %s1765_s15  ;;  %s1508_s11 = sshll.u32 (%p1829_p3), %s286_s9, 3 }
  0x1e   : > { %s288_s23 = scalar_lea.vmem (%p1829_p3), [#allocation7], %s1508_s11 }
  0x1f   : > { %s1412_s22 = scalar_lea.vmem (%p1829_p3), %s2200_s2, %s1509_s10 }
  0x20   : > { %v1510_v4 = vld [vmem:[%s1412_s22 + $0x8] sm:$0xf] (%p1829_p3)  ;;  %v1511_v5 = vld [vmem:[%s1412_s22 + $0x14] sm:$0xf] (%p1829_p3) }
  0x21   : > { %314 = vst [vmem:[%s288_s23] sm:$0xf] (%p1829_p3), %v1510_v4  ;;  %316 = vst [vmem:[%s288_s23 + $0x4] sm:$0xf] (%p1829_p3), %v1511_v5 }
  0x23 PF: > { %p1512_p6 = scmp.ge.s32.totalorder %s1769_s16, 1  ;;  %p342_p7 = scmp.lt.s32.totalorder %s1769_s16, 3 }
  0x25   : > { %p343_p8 = pnand %p1512_p6, %p342_p7 }
  0x26   : > { %s349_s18 = sand.u32 (!%p343_p8), 1, %s1753_s12   ;;  %v1771_v6 = vmov (!%p343_p8), 0.0   ;;  %vm1772_vm0 = vmmov (!%p343_p8), 0   ;;  %vm473_vm1 = vcmask (!%p343_p8), 261120   ;;  %vm420_vm2 = vcmask (!%p343_p8), 7168   ;;  %s1775_s26 = smov (!%p343_p8), 96  }
  0x27   : > { %346 = sbr.rel (%p343_p8) target bundleno = 1456 (0x5b0), region = 143  ;;  %1573 = vmatprep.subr.bf16.mxu0 (!%p343_p8), %v1771_v6  ;;  %437 = vst [vmem:[#allocation4] sm:$0xff] (!%p343_p8), %v1771_v6  ;;  %438 = vst [vmem:[#allocation4 + $0x8] sm:$0xff] (!%p343_p8), %v1771_v6  ;;  %s1867_s24 = sshll.u32 (!%p343_p8), %s349_s18, 3  ;;  %1575 = vmatprep.mubr.msk.bf16.mxu0 (!%p343_p8), %vm1772_vm0, %v1771_v6  ;;  %v1773_v10 = vmov (!%p343_p8), -1e+30   ;;  %v443_v11 = vlaneseq (!%p343_p8) }
  0x28   : > { %1579 = vmatprep.subr.bf16.mxu1 (!%p343_p8), %v1771_v6  ;;  %1581 = vmatprep.mubr.msk.bf16.mxu1 (!%p343_p8), %vm1772_vm0, %v1771_v6  ;;  %s1875_s12 = scalar_lea.vmem (!%p343_p8), [#allocation6], %s1867_s24  ;;  %s1879_s25 = scalar_lea.vmem (!%p343_p8), [#allocation5], %s1867_s24  ;;  %421 = vst.msk [vmem:[#allocation2] sm:$0xff] (!%p343_p8), %vm420_vm2, %v1773_v10  ;;  %422 = vst.msk [vmem:[#allocation2 + $0x8] sm:$0xff] (!%p343_p8), %vm420_vm2, %v1773_v10  ;;  %vm525_vm4 = vcmask (!%p343_p8), 130048   ;;  %v1774_v23 = vmov (!%p343_p8), 0  }
  0x29   : > { %v1671_v7 = vld [vmem:[%s1875_s12] sm:$0xff] (!%p343_p8)   ;;  %v1672_v9 = vld [vmem:[%s1879_s25] sm:$0xff] (!%p343_p8)   ;;  %423 = vst.msk [vmem:[#allocation2 + $0x10] sm:$0xff] (!%p343_p8), %vm420_vm2, %v1773_v10  ;;  %424 = vst.msk [vmem:[#allocation2 + $0x18] sm:$0xff] (!%p343_p8), %vm420_vm2, %v1773_v10  ;;  %v1911_v12 = vshrl.u32 (!%p343_p8), %v443_v11, 7  ;;  %v1913_v13 = vand.u32 (!%p343_p8), 127, %v443_v11  ;;  %1669 = vset.pattern.permute.xlu1 (!%p343_p8), %v1774_v23  ;;  %1670 = vset.pattern.permute.xlu0 (!%p343_p8), %v1774_v23 }
  0x2a   : > { %v478_v8 = vsel (!%p343_p8), %vm473_vm1, %v1671_v7, 0  ;;  %425 = vst.msk [vmem:[#allocation2 + $0x20] sm:$0xff] (!%p343_p8), %vm420_vm2, %v1773_v10  ;;  %426 = vst.msk [vmem:[#allocation2 + $0x28] sm:$0xff] (!%p343_p8), %vm420_vm2, %v1773_v10  ;;  %v1673_v24 = vld [vmem:[%s1875_s12] sm:$0xff] (!%p343_p8)   ;;  %v1674_v33 = vld [vmem:[%s1879_s25] sm:$0xff] (!%p343_p8)   ;;  %s1956_s27 = scalar_lea.vmem (!%p343_p8), [#allocation7], %s1867_s24 }
  0x2b   : > { %1574 = vmatpush3.bf16.xpose.msra.mxu0 (!%p343_p8), %v478_v8  ;;  %427 = vst.msk [vmem:[#allocation2 + $0x30] sm:$0xff] (!%p343_p8), %vm420_vm2, %v1773_v10  ;;  %428 = vst.msk [vmem:[#allocation2 + $0x38] sm:$0xff] (!%p343_p8), %vm420_vm2, %v1773_v10  ;;  %v1916_v14 = vadd.s32 (!%p343_p8), 8, %v1911_v12  ;;  %vm455_vm3 = vcmp.le.s32.totalorder (!%p343_p8), %v1913_v13, %v1911_v12  ;;  %v1675_v34 = vld [vmem:[%s1875_s12] sm:$0xff] (!%p343_p8)   ;;  %v1679_v35 = vld [vmem:[%s1956_s27] sm:$0xff] (!%p343_p8)   ;;  %s1776_s28 = smov (!%p343_p8), 64  }
  0x2c   : > { %1591 = vmatprep.subr.bf16.mxu0 (!%p343_p8), %v1771_v6  ;;  %429 = vst.msk [vmem:[#allocation3] sm:$0xff] (!%p343_p8), %vm420_vm2, %v1771_v6  ;;  %430 = vst.msk [vmem:[#allocation3 + $0x8] sm:$0xff] (!%p343_p8), %vm420_vm2, %v1771_v6  ;;  %1580 = vmatpush3.bf16.msra.mxu1 (!%p343_p8), %v1679_v35  ;;  %v1676_v36 = vld [vmem:[%s1879_s25] sm:$0xff] (!%p343_p8)   ;;  %v1677_v37 = vld [vmem:[%s1875_s12] sm:$0xff] (!%p343_p8)   ;;  %s1777_s29 = smov (!%p343_p8), 32   ;;  %vm836_vm6 = vcmask (!%p343_p8), 523520  }
  0x2d   : > { %431 = vst.msk [vmem:[#allocation3 + $0x10] sm:$0xff] (!%p343_p8), %vm420_vm2, %v1771_v6  ;;  %432 = vst.msk [vmem:[#allocation3 + $0x18] sm:$0xff] (!%p343_p8), %vm420_vm2, %v1771_v6  ;;  %vm456_vm5 = vcmp.le.s32.totalorder (!%p343_p8), %v1913_v13, %v1916_v14  ;;  %1585 = vmatprep.subr.bf16.mxu1 (!%p343_p8), %v1771_v6  ;;  %v1678_v38 = vld [vmem:[%s1879_s25] sm:$0xff] (!%p343_p8)   ;;  %vm1035_vm7 = vcmask (!%p343_p8), 785920   ;;  %vm1234_vm8 = vcmask (!%p343_p8), 1048320   ;;  %p406_p9 = scmp.lt.s32.totalorder (!%p343_p8), %s1761_s14, 1 }
  0x2e   : > { %433 = vst.msk [vmem:[#allocation3 + $0x20] sm:$0xff] %vm420_vm2, %v1771_v6  ;;  %434 = vst.msk [vmem:[#allocation3 + $0x28] sm:$0xff] %vm420_vm2, %v1771_v6  ;;  %v1680_v14 = vld [vmem:[%s1956_s27] sm:$0xff]   ;;  %vm1268_vm9 = vcmask 257024   ;;  %vm1298_vm10 = vcmask 519424   ;;  %vm1328_vm11 = vcmask 781824  }
  0x2f   : > { %435 = vst.msk [vmem:[#allocation3 + $0x30] sm:$0xff] %vm420_vm2, %v1771_v6  ;;  %436 = vst.msk [vmem:[#allocation3 + $0x38] sm:$0xff] %vm420_vm2, %v1771_v6  ;;  %v1932_v25 = vld [vmem:[#allocation2] sm:$0xff]  ;;  %v1937_v28 = vld [vmem:[#allocation2 + $0x8] sm:$0xff]  ;;  %s2210_s14 = smov (!%p406_p9, %s1761_s14), 1  ;;  %vm1358_vm12 = vcmask 1044224  }
  0x30   : > { %v2034_v12 = vld [vmem:[#allocation2 + $0x10] sm:$0xff]  ;;  %s1548_s30 = sshll.u32 %s2210_s14, 3 }
  0x31   : > { %s413_s6 = scalar_lea.vmem %s2201_s3, %s1548_s30 }
  0x32   : > { %1576 = vmatmul.mubr.msk.bf16.vlgmr.msra.gmra.mrb[0].mxu0 %vm473_vm1, %v1672_v9 }
  0x33   : > { %1593 = vmatprep.mubr.msk.bf16.mxu0 %vm1772_vm0, %v1771_v6 }
 0x105   : > { %v514_v15 = vpop.f32.mrb[0].mxu0 }
 0x106   : > { %v521_v16 = vsel %vm455_vm3, %v514_v15, -1e+30  ;;  %v1577_v17 = vpop.f32.mrb[1].mxu0 }
 0x107   : > { %v517_v18 = vpop.f32.mrb[2].mxu0  ;;  %v526_v19 = vsel %vm525_vm4, %v521_v16, -inf }
 0x108   : > { %v522_v20 = vsel %vm456_vm5, %v517_v18, -1e+30  ;;  %527 = vmax.xlane.f32.xlu0 %v526_v19  ;;  %v1578_v21 = vpop.f32.mrb[3].mxu0 }
 0x109   : > { %v529_v22 = vsel %vm525_vm4, %v522_v20, -inf }
 0x10c   : > { %530 = vmax.xlane.f32.xlu0 %v529_v22 }
 0x122   : > { %660 = vrot.lane.b32.xlu0 %v1673_v24, %s1775_s26 }
 0x195   : > { %v528_v26 = vpop.xlane.xlu0 %527 }
 0x196   : > { %v1935_v27 = vmax.f32 %v1932_v25, %v528_v26 }
 0x198   : > { %v534_v29 = vsub.f32 %v1932_v25, %v1935_v27  ;;  %640 = vst.msk [vmem:[#allocation2] sm:$0xff] %vm420_vm2, %v1935_v27  ;;  %542 = vperm.xlu1 %1669, %v1935_v27  }
 0x199   : > { %v531_v30 = vpop.xlane.xlu0 %530 }
 0x19a   : > { %v1945_v31 = vmax.f32 %v1937_v28, %v531_v30  ;;  %v713_v30 = vld [vmem:[#allocation2 + $0x18] sm:$0xff] }
 0x19c   : > { %v535_v32 = vsub.f32 %v1937_v28, %v1945_v31  ;;  %641 = vst.msk [vmem:[#allocation2 + $0x8] sm:$0xff] %vm420_vm2, %v1945_v31  ;;  %547 = vperm.xlu1 %1669, %v1945_v31  }
 0x19d   : > { %v661_v46 = vpop.permute.xlu0 %660 }
 0x19e   : > { %v666_v49 = vsel %vm473_vm1, %v661_v46, 0  ;;  %v1681_v46 = vld [vmem:[%s1956_s27] sm:$0xff]  }
 0x1a0   : > { %653 = vrot.lane.b32.xlu1 %v1674_v33, %s1775_s26 }
 0x1a4   : > { %859 = vrot.lane.b32.xlu1 %v1675_v34, %s1776_s28 }
 0x1a8   : > { %852 = vrot.lane.b32.xlu1 %v1676_v36, %s1776_s28 }
 0x1ac   : > { %1058 = vrot.lane.b32.xlu1 %v1677_v37, %s1777_s29  ;;  %v2046_v37 = vld [vmem:[#allocation2 + $0x20] sm:$0xff] }
 0x1b0   : > { %1051 = vrot.lane.b32.xlu1 %v1678_v38, %s1777_s29 }
 0x217   : > { %v543_v39 = vpop.permute.xlu1 %542 }
 0x218   : > { %v550_v40 = vsub.f32 %v521_v16, %v543_v39  ;;  %v2049_v39 = vld [vmem:[#allocation2 + $0x28] sm:$0xff] }
 0x21a   : > { %v552_v41 = vmul.f32 1.442695, %v550_v40 }
 0x21b   : > { %v548_v42 = vpop.permute.xlu1 %547 }
 0x21c   : > { %v551_v43 = vsub.f32 %v522_v20, %v548_v42  ;;  %1683 = vpow2.f32 %v552_v41 }
 0x21e   : > { %v554_v44 = vmul.f32 1.442695, %v551_v43 }
 0x21f   : > { %v654_v45 = vpop.permute.xlu1 %653 }
 0x220   : > { %1685 = vpow2.f32 %v554_v44 }
 0x223   : > { %v860_v51 = vpop.permute.xlu1 %859 }
 0x224   : > { %v865_v53 = vsel %vm473_vm1, %v860_v51, 0 }
 0x226   : > { %v1967_v47 = vpop.eup %1683 }
 0x227   : > { %v853_v52 = vpop.permute.xlu1 %852 }
 0x22a   : > { %v1969_v48 = vpop.eup %1685 }
 0x22b   : > { %v585_v50 = vpack.c.bf16 %v1969_v48, %v1967_v47  ;;  %v1059_v54 = vpop.permute.xlu1 %1058 }
 0x22c   : > { %v1064_v55 = vsel %vm473_vm1, %v1059_v54, 0 }
 0x22d   : > { %1582 = vmatmul.mubr.msk.bf16.vlgmr.msra.gmra.mrb[0].mxu1 %vm525_vm4, %v585_v50  ;;  %v2070_v50 = vld [vmem:[#allocation2 + $0x38] sm:$0xff] }
 0x22e   : > { %1586 = vmatpush3.bf16.xpose.msra.mxu1 %v666_v49  ;;  %1587 = vmatprep.mubr.msk.bf16.mxu1 %vm1772_vm0, %v1771_v6 }
 0x22f   : > { %1597 = vmatprep.subr.bf16.mxu1 %v1771_v6  ;;  %v1052_v56 = vpop.permute.xlu1 %1051 }
 0x235   : > { %1588 = vmatmul.mubr.msk.bf16.vlgmr.msra.gmra.mrb[4].mxu1 %vm473_vm1, %v654_v45  ;;  %v2066_v45 = vld [vmem:[#allocation2 + $0x30] sm:$0xff] }
 0x236   : > { %1598 = vmatpush3.bf16.xpose.msra.mxu1 %v865_v53  ;;  %1599 = vmatprep.mubr.msk.bf16.mxu1 %vm1772_vm0, %v1771_v6 }
 0x237   : > { %1609 = vmatprep.subr.bf16.mxu1 %v1771_v6 }
 0x23d   : > { %1600 = vmatmul.mubr.msk.bf16.vlgmr.msra.gmra.mrb[8].mxu1 %vm473_vm1, %v853_v52 }
 0x23e   : > { %1610 = vmatpush3.bf16.xpose.msra.mxu1 %v1064_v55  ;;  %1611 = vmatprep.mubr.msk.bf16.mxu1 %vm1772_vm0, %v1771_v6 }
 0x245   : > { %1612 = vmatmul.mubr.msk.bf16.vlgmr.msra.gmra.mrb[12].mxu1 %vm473_vm1, %v1052_v56  ;;  %v1682_v56 = vld [vmem:[%s1956_s27] sm:$0xff]  }
 0x300   : > { %v1988_v57 = vpop.f32.mrb[0].mxu1 }
 0x301   : > { %v1583_v58 = vpop.f32.mrb[1].mxu1 }
 0x302   : > { %v1990_v59 = vpop.f32.mrb[2].mxu1  ;;  %v563_v58 = vsel %vm525_vm4, %v1969_v48, 0.0 }
 0x303   : > { %v1584_v60 = vpop.f32.mrb[3].mxu1 }
 0x304   : > { %v536_v60 = vmul.f32 1.442695, %v534_v29 }
 0x306   : > { %1687 = vpow2.f32 %v536_v60 }
 0x308   : > { %v702_v61 = vpop.f32.mrb[4].mxu1 }
 0x309   : > { %v1995_v62 = vsel %vm455_vm3, %v702_v61, -1e+30  ;;  %v1589_v63 = vpop.f32.mrb[5].mxu1 }
 0x30a   : > { %v705_v0 = vpop.f32.mrb[6].mxu1  ;;  %v714_v1 = vsel %vm525_vm4, %v1995_v62, -inf  ;;  %v560_v63 = vsel %vm525_vm4, %v1967_v47, 0.0 }
 0x30b   : > { %v2002_v2 = vsel %vm456_vm5, %v705_v0, -1e+30  ;;  %715 = vmax.xlane.f32.xlu1 %v714_v1  ;;  %v1590_v3 = vpop.f32.mrb[7].mxu1  ;;  %v538_v0 = vmul.f32 1.442695, %v535_v32 }
 0x30c   : > { %v717_v4 = vsel %vm525_vm4, %v2002_v2, -inf }
 0x30d   : > { %718 = vmax.xlane.f32.xlu0 %v717_v4  ;;  %1689 = vpow2.f32 %v538_v0 }
 0x310   : > { %v901_v5 = vpop.f32.mrb[8].mxu1  ;;  %v2096_v61 = vpop.eup %1687 }
 0x311   : > { %v2009_v7 = vsel %vm455_vm3, %v901_v5, -1e+30  ;;  %v1601_v8 = vpop.f32.mrb[9].mxu1 }
 0x312   : > { %v904_v9 = vpop.f32.mrb[10].mxu1  ;;  %v913_v10 = vsel %vm525_vm4, %v2009_v7, -inf }
 0x313   : > { %v2016_v11 = vsel %vm456_vm5, %v904_v9, -1e+30  ;;  %914 = vmax.xlane.f32.xlu0 %v913_v10  ;;  %v1602_v15 = vpop.f32.mrb[11].mxu1 }
 0x314   : > { %v916_v16 = vsel %vm525_vm4, %v2016_v11, -inf }
 0x315   : > { %917 = vmax.xlane.f32.xlu1 %v916_v16 }
 0x317   : > { %v2104_v1 = vpop.eup %1689 }
 0x318   : > { %v1100_v17 = vpop.f32.mrb[12].mxu1 }
 0x319   : > { %v2023_v18 = vsel %vm455_vm3, %v1100_v17, -1e+30  ;;  %v1613_v19 = vpop.f32.mrb[13].mxu1 }
 0x31a   : > { %v1103_v20 = vpop.f32.mrb[14].mxu1  ;;  %v1112_v21 = vsel %vm525_vm4, %v2023_v18, -inf }
 0x31b   : > { %v2030_v22 = vsel %vm456_vm5, %v1103_v20, -1e+30  ;;  %v1614_v23 = vpop.f32.mrb[15].mxu1  ;;  %1113 = vmax.xlane.f32.xlu0 %v1112_v21 }
 0x31c   : > { %v1115_v24 = vsel %vm525_vm4, %v2030_v22, -inf }
 0x31d   : > { %1116 = vmax.xlane.f32.xlu1 %v1115_v24 }
 0x398   : > { %v716_v26 = vpop.xlane.xlu1 %715 }
 0x399   : > { %v2037_v33 = vmax.f32 %v2034_v12, %v716_v26 }
 0x39a   : > { %v719_v34 = vpop.xlane.xlu0 %718 }
 0x39b   : > { %v722_v35 = vsub.f32 %v2034_v12, %v2037_v33  ;;  %839 = vst.msk [vmem:[#allocation2 + $0x10] sm:$0xff] %vm420_vm2, %v2037_v33  ;;  %v721_v13 = vmax.f32 %v713_v30, %v719_v34  ;;  %730 = vperm.xlu0 %1670, %v2037_v33  }
 0x39d   : > { %v723_v36 = vsub.f32 %v713_v30, %v721_v13  ;;  %840 = vst.msk [vmem:[#allocation2 + $0x18] sm:$0xff] %vm420_vm2, %v721_v13  ;;  %735 = vperm.xlu1 %1669, %v721_v13  }
 0x39f   : > { %1177 = vrot.lane.b32.xlu0 %v1680_v14, %s1777_s29  ;;  %v726_v48 = vmul.f32 1.442695, %v723_v36 }
 0x3a0   : > { %v915_v38 = vpop.xlane.xlu0 %914 }
 0x3a1   : > { %v2052_v40 = vmax.f32 %v2046_v37, %v915_v38  ;;  %1691 = vpow2.f32 %v726_v48  ;;  %v724_v38 = vmul.f32 1.442695, %v722_v35 }
 0x3a2   : > { %v918_v41 = vpop.xlane.xlu1 %917 }
 0x3a3   : > { %v921_v42 = vsub.f32 %v2046_v37, %v2052_v40  ;;  %1038 = vst.msk [vmem:[#allocation2 + $0x20] sm:$0xff] %vm420_vm2, %v2052_v40  ;;  %v2059_v43 = vmax.f32 %v2049_v39, %v918_v41  ;;  %929 = vperm.xlu1 %1669, %v2052_v40  }
 0x3a5   : > { %v922_v44 = vsub.f32 %v2049_v39, %v2059_v43  ;;  %1039 = vst.msk [vmem:[#allocation2 + $0x28] sm:$0xff] %vm420_vm2, %v2059_v43  ;;  %v944_v39 = vld [vmem:[#allocation3 + $0x20] sm:$0xff] }
 0x3a7   : > { %934 = vperm.xlu1 %1669, %v2059_v43  }
 0x3a8   : > { %v1114_v49 = vpop.xlane.xlu0 %1113 }
 0x3a9   : > { %v2073_v51 = vmax.f32 %v2066_v45, %v1114_v49  ;;  %v923_v49 = vmul.f32 1.442695, %v921_v42 }
 0x3aa   : > { %v1117_v52 = vpop.xlane.xlu1 %1116 }
 0x3ab   : > { %779 = vrot.lane.b32.xlu1 %v1681_v46, %s1775_s26  ;;  %v1120_v53 = vsub.f32 %v2066_v45, %v2073_v51  ;;  %1237 = vst.msk [vmem:[#allocation2 + $0x30] sm:$0xff] %vm420_vm2, %v2073_v51  ;;  %v2081_v54 = vmax.f32 %v2070_v50, %v1117_v52  ;;  %v2107_v25 = vpop.eup %1691 }
 0x3ad   : > { %v1121_v55 = vsub.f32 %v2070_v50, %v2081_v54  ;;  %1238 = vst.msk [vmem:[#allocation2 + $0x38] sm:$0xff] %vm420_vm2, %v2081_v54  ;;  %v1144_v50 = vld [vmem:[#allocation3 + $0x38] sm:$0xff] }
 0x3af   : > { %1128 = vperm.xlu1 %1669, %v2073_v51   ;;  %v1124_v43 = vmul.f32 1.442695, %v1121_v55 }
 0x3b3   : > { %1133 = vperm.xlu1 %1669, %v2081_v54  }
 0x3b7   : > { %978 = vrot.lane.b32.xlu1 %v1682_v56, %s1776_s28 }
 0x3be   : > { %564 = vadd.xlane.f32.xlu0 %v563_v58 }
 0x3d4   : > { %575 = vperm.xlu0 %1670, %v2096_v61  }
 0x3db   : > { %561 = vadd.xlane.f32.xlu1 %v560_v63  ;;  %v556_v63 = vld [vmem:[#allocation3] sm:$0xff] }
 0x3dc   : > { %v558_v0 = vmul.f32 %v2096_v61, %v556_v63 }
 0x3ec   : > { %580 = vperm.xlu1 %1669, %v2104_v1  }
 0x3f0   : > { %768 = vperm.xlu1 %1669, %v2107_v25  }
 0x41a   : > { %v731_v27 = vpop.permute.xlu0 %730 }
 0x41b   : > { %v738_v29 = vsub.f32 %v1995_v62, %v731_v27 }
 0x41c   : > { %v736_v47 = vpop.permute.xlu1 %735 }
 0x41d   : > { %v740_v3 = vmul.f32 1.442695, %v738_v29  ;;  %v739_v4 = vsub.f32 %v2002_v2, %v736_v47 }
 0x41e   : > { %v1178_v36 = vpop.permute.xlu0 %1177 }
 0x41f   : > { %1693 = vpow2.f32 %v740_v3  ;;  %v742_v28 = vmul.f32 1.442695, %v739_v4  ;;  %v925_v3 = vmul.f32 1.442695, %v922_v44  ;;  %v745_v4 = vld [vmem:[#allocation3 + $0x10] sm:$0xff] }
 0x421   : > { %1695 = vpow2.f32 %v742_v28  ;;  %v746_v28 = vld [vmem:[#allocation3 + $0x18] sm:$0xff] }
 0x422   : > { %v930_v31 = vpop.permute.xlu1 %929 }
 0x423   : > { %v937_v32 = vsub.f32 %v2009_v7, %v930_v31 }
 0x425   : > { %v939_v5 = vmul.f32 1.442695, %v937_v32 }
 0x426   : > { %v935_v8 = vpop.permute.xlu1 %934 }
 0x427   : > { %1697 = vpow2.f32 %v939_v5  ;;  %v938_v9 = vsub.f32 %v2016_v11, %v935_v8  ;;  %v748_v5 = vmul.f32 %v2107_v25, %v746_v28  ;;  %v945_v25 = vld [vmem:[#allocation3 + $0x28] sm:$0xff] }
 0x429   : > { %v1694_v10 = vpop.eup %1693  ;;  %v941_v15 = vmul.f32 1.442695, %v938_v9 }
 0x42a   : > { %v780_v16 = vpop.permute.xlu1 %779  ;;  %v749_v62 = vsel %vm525_vm4, %v1694_v10, 0.0 }
 0x42b   : > { %v1696_v17 = vpop.eup %1695  ;;  %1699 = vpow2.f32 %v941_v15  ;;  %750 = vadd.xlane.f32.xlu1 %v749_v62  ;;  %1592 = vmatpush3.bf16.msra.mxu0 %v780_v16 }
 0x42c   : > { %v752_v2 = vsel %vm525_vm4, %v1696_v17, 0.0  ;;  %v773_v19 = vpack.c.bf16 %v1696_v17, %v1694_v10  ;;  %1603 = vmatprep.subr.bf16.mxu0 %v1771_v6  ;;  %v1143_v17 = vld [vmem:[#allocation3 + $0x30] sm:$0xff] }
 0x42d   : > { %753 = vadd.xlane.f32.xlu0 %v752_v2 }
 0x42e   : > { %1594 = vmatmul.mubr.msk.bf16.vlgmr.msra.gmra.mrb[4].mxu0 %vm525_vm4, %v773_v19  ;;  %v1129_v7 = vpop.permute.xlu1 %1128 }
 0x42f   : > { %v1136_v11 = vsub.f32 %v2023_v18, %v1129_v7  ;;  %1605 = vmatprep.mubr.msk.bf16.mxu0 %vm1772_vm0, %v1771_v6 }
 0x431   : > { %v1698_v20 = vpop.eup %1697  ;;  %v1138_v21 = vmul.f32 1.442695, %v1136_v11 }
 0x432   : > { %v1134_v23 = vpop.permute.xlu1 %1133  ;;  %v948_v24 = vsel %vm525_vm4, %v1698_v20, 0.0 }
 0x433   : > { %1701 = vpow2.f32 %v1138_v21  ;;  %v1137_v26 = vsub.f32 %v2030_v22, %v1134_v23  ;;  %949 = vadd.xlane.f32.xlu1 %v948_v24 }
 0x435   : > { %v1700_v30 = vpop.eup %1699  ;;  %v1140_v34 = vmul.f32 1.442695, %v1137_v26 }
 0x436   : > { %v979_v13 = vpop.permute.xlu1 %978  ;;  %v951_v14 = vsel %vm525_vm4, %v1700_v30, 0.0  ;;  %v972_v18 = vpack.c.bf16 %v1700_v30, %v1698_v20 }
 0x437   : > { %1703 = vpow2.f32 %v1140_v34  ;;  %952 = vadd.xlane.f32.xlu0 %v951_v14  ;;  %1604 = vmatpush3.bf16.msra.mxu0 %v979_v13 }
 0x438   : > { %1615 = vmatprep.subr.bf16.mxu0 %v1771_v6  ;;  %1705 = vpow2.f32 %v724_v38 }
 0x439   : > { %1707 = vpow2.f32 %v923_v49 }
 0x43a   : > { %1606 = vmatmul.mubr.msk.bf16.vlgmr.msra.gmra.mrb[8].mxu0 %vm525_vm4, %v972_v18  ;;  %1709 = vpow2.f32 %v925_v3 }
 0x43b   : > { %1616 = vmatpush3.bf16.msra.mxu0 %v1178_v36  ;;  %1617 = vmatprep.mubr.msk.bf16.mxu0 %vm1772_vm0, %v1771_v6  ;;  %v557_v6 = vld [vmem:[#allocation3 + $0x8] sm:$0xff] }
 0x43c   : > { %v559_v12 = vmul.f32 %v2104_v1, %v557_v6 }
 0x43d   : > { %v1702_v22 = vpop.eup %1701 }
 0x43e   : > { %v1147_v41 = vsel %vm525_vm4, %v1702_v22, 0.0 }
 0x43f   : > { %1148 = vadd.xlane.f32.xlu1 %v1147_v41 }
 0x441   : > { %v1704_v46 = vpop.eup %1703 }
 0x442   : > { %v1150_v52 = vsel %vm525_vm4, %v1704_v46, 0.0  ;;  %v1171_v56 = vpack.c.bf16 %v1704_v46, %v1702_v22  ;;  %v1706_v35 = vpop.eup %1705 }
 0x443   : > { %1151 = vadd.xlane.f32.xlu1 %v1150_v52  ;;  %v1708_v60 = vpop.eup %1707  ;;  %v747_v61 = vmul.f32 %v1706_v35, %v745_v4 }
 0x444   : > { %1618 = vmatmul.mubr.msk.bf16.vlgmr.msra.gmra.mrb[12].mxu0 %vm525_vm4, %v1171_v56  ;;  %v946_v44 = vmul.f32 %v1708_v60, %v944_v39  ;;  %v1710_v10 = vpop.eup %1709 }
 0x445   : > { %v947_v45 = vmul.f32 %v1710_v10, %v945_v25 }
 0x44b   : > { %v565_v33 = vpop.xlane.xlu0 %564 }
 0x44c   : > { %v567_v58 = vadd.f32 %v565_v33, %v559_v12 }
 0x44d   : > { %763 = vperm.xlu0 %1670, %v1706_v35  }
 0x44e   : > { %570 = vst.msk [vmem:[#allocation3 + $0x8] sm:$0xff] %vm420_vm2, %v567_v58 }
 0x451   : > { %962 = vperm.xlu0 %1670, %v1708_v60  }
 0x453   : > { %v576_v37 = vpop.permute.xlu0 %575 }
 0x454   : > { %v583_v40 = vmul.f32 0.0, %v576_v37 }
 0x455   : > { %v1243_v13 = vld [vmem:[#allocation3 + $0x8] sm:$0xff] }
 0x456   : > { %v636_v42 = vadd.f32 %v1988_v57, %v583_v40 }
 0x458   : > { %638 = vst.msk [vmem:[#allocation4] sm:$0xff] %vm473_vm1, %v636_v42 }
 0x468   : > { %v562_v48 = vpop.xlane.xlu1 %561 }
 0x469   : > { %v566_v27 = vadd.f32 %v562_v48, %v558_v0 }
 0x46b   : > { %569 = vst.msk [vmem:[#allocation3] sm:$0xff] %vm420_vm2, %v566_v27 }
 0x46c   : > { %v581_v1 = vpop.permute.xlu1 %580 }
 0x46d   : > { %v584_v29 = vmul.f32 0.0, %v581_v1  ;;  %v759_v1 = vld [vmem:[#allocation4] sm:$0xff] }
 0x46f   : > { %v637_v47 = vadd.f32 %v1990_v59, %v584_v29  ;;  %v1122_v59 = vmul.f32 1.442695, %v1120_v53 }
 0x470   : > { %v2148_v57 = vpop.permute.xlu1 %768 }
 0x471   : > { %639 = vst.msk [vmem:[#allocation4 + $0x8] sm:$0xff] %vm473_vm1, %v637_v47  ;;  %1711 = vpow2.f32 %v1122_v59 }
 0x472   : > { %1713 = vpow2.f32 %v1124_v43  ;;  %v1242_v21 = vld [vmem:[#allocation3] sm:$0xff] }
 0x473   : > { %1715 = vrcp.f32 %v1242_v21 }
 0x478   : > { %v760_v27 = vld [vmem:[#allocation4 + $0x8] sm:$0xff] }
 0x479   : > { %v772_v4 = vmul.f32 %v2148_v57, %v760_v27 }
 0x47b   : > { %v1712_v62 = vpop.eup %1711 }
 0x47c   : > { %v1145_v2 = vmul.f32 %v1712_v62, %v1143_v17  ;;  %v1714_v19 = vpop.eup %1713 }
 0x47d   : > { %v1146_v55 = vmul.f32 %v1714_v19, %v1144_v50  ;;  %v1716_v18 = vpop.eup %1715 }
 0x4b8   : > { %v751_v31 = vpop.xlane.xlu1 %750 }
 0x4b9   : > { %v755_v32 = vadd.f32 %v751_v31, %v747_v61 }
 0x4ba   : > { %v754_v8 = vpop.xlane.xlu0 %753 }
 0x4bb   : > { %757 = vst.msk [vmem:[#allocation3 + $0x10] sm:$0xff] %vm420_vm2, %v755_v32  ;;  %v756_v9 = vadd.f32 %v754_v8, %v748_v5 }
 0x4bd   : > { %758 = vst.msk [vmem:[#allocation3 + $0x18] sm:$0xff] %vm420_vm2, %v756_v9 }
 0x4c0   : > { %v950_v15 = vpop.xlane.xlu1 %949 }
 0x4c1   : > { %v954_v16 = vadd.f32 %v950_v15, %v946_v44 }
 0x4c2   : > { %v1272_v34 = vld [vmem:[#allocation3 + $0x10] sm:$0xff] }
 0x4c3   : > { %956 = vst.msk [vmem:[#allocation3 + $0x20] sm:$0xff] %vm420_vm2, %v954_v16  ;;  %1717 = vrcp.f32 %v1272_v34 }
 0x4c4   : > { %v953_v51 = vpop.xlane.xlu0 %952  ;;  %1719 = vrcp.f32 %v1243_v13  ;;  %v1273_v14 = vld [vmem:[#allocation3 + $0x18] sm:$0xff] }
 0x4c5   : > { %v955_v53 = vadd.f32 %v953_v51, %v947_v45  ;;  %1721 = vrcp.f32 %v1273_v14 }
 0x4c7   : > { %957 = vst.msk [vmem:[#allocation3 + $0x28] sm:$0xff] %vm420_vm2, %v955_v53 }
 0x4ca   : > { %v1302_v38 = vld [vmem:[#allocation3 + $0x20] sm:$0xff] }
 0x4cb   : > { %1723 = vrcp.f32 %v1302_v38 }
 0x4cc   : > { %v1149_v7 = vpop.xlane.xlu1 %1148  ;;  %v764_v48 = vpop.permute.xlu0 %763 }
 0x4cd   : > { %v1153_v54 = vadd.f32 %v1149_v7, %v1145_v2  ;;  %v1718_v49 = vpop.eup %1717  ;;  %v771_v47 = vmul.f32 %v764_v48, %v759_v1 }
 0x4ce   : > { %v1303_v56 = vld [vmem:[#allocation3 + $0x28] sm:$0xff]  ;;  %v1720_v6 = vpop.eup %1719 }
 0x4cf   : > { %1155 = vst.msk [vmem:[#allocation3 + $0x30] sm:$0xff] %vm420_vm2, %v1153_v54  ;;  %v1722_v58 = vpop.eup %1721 }
 0x4d0   : > { %v1152_v11 = vpop.xlane.xlu1 %1151  ;;  %v963_v29 = vpop.permute.xlu0 %962 }
 0x4d1   : > { %v1154_v20 = vadd.f32 %v1152_v11, %v1146_v55 }
 0x4d3   : > { %1156 = vst.msk [vmem:[#allocation3 + $0x38] sm:$0xff] %vm420_vm2, %v1154_v20 }
 0x4d5   : > { %v1724_v40 = vpop.eup %1723 }
 0x4d6   : > { %v1332_v52 = vld [vmem:[#allocation3 + $0x30] sm:$0xff] }
 0x4d7   : > { %1725 = vrcp.f32 %v1332_v52 }
 0x4d8   : > { %1727 = vrcp.f32 %v1303_v56 }
 0x4da   : > { %v1333_v35 = vld [vmem:[#allocation3 + $0x38] sm:$0xff] }
 0x4db   : > { %1729 = vrcp.f32 %v1333_v35 }
 0x4e1   : > { %v1726_v42 = vpop.eup %1725 }
 0x4e2   : > { %v1728_v63 = vpop.eup %1727 }
 0x4e5   : > { %v1730_v0 = vpop.eup %1729 }
 0x501   : > { %v819_v23 = vpop.f32.mrb[4].mxu0 }
 0x502   : > { %828 = vrot.lane.b32.xlu1 %v819_v23, %s1777_s29  ;;  %v1595_v24 = vpop.f32.mrb[5].mxu0 }
 0x503   : > { %v822_v26 = vpop.f32.mrb[6].mxu0 }
 0x504   : > { %830 = vrot.lane.b32.xlu0 %v822_v26, %s1777_s29  ;;  %v1596_v30 = vpop.f32.mrb[7].mxu0 }
 0x506   : > { %967 = vperm.xlu1 %1669, %v1710_v10  }
 0x508   : > { %1166 = vperm.xlu0 %1670, %v1714_v19  }
 0x50a   : > { %1161 = vperm.xlu1 %1669, %v1712_v62  }
 0x50d   : > { %v1018_v36 = vpop.f32.mrb[8].mxu0 }
 0x50e   : > { %1250 = vperm.xlu1 %1669, %v1716_v18   ;;  %1027 = vrot.lane.b32.xlu0 %v1018_v36, %s1776_s28  ;;  %v1607_v22 = vpop.f32.mrb[9].mxu0 }
 0x50f   : > { %v1021_v41 = vpop.f32.mrb[10].mxu0 }
 0x510   : > { %v1608_v46 = vpop.f32.mrb[11].mxu0 }
 0x512   : > { %1280 = vperm.xlu1 %1669, %v1718_v49   ;;  %1029 = vrot.lane.b32.xlu0 %v1021_v41, %s1776_s28 }
 0x516   : > { %1255 = vperm.xlu0 %1670, %v1720_v6  }
 0x517   : > { %v1217_v12 = vpop.f32.mrb[12].mxu0 }
 0x518   : > { %1226 = vrot.lane.b32.xlu1 %v1217_v12, %s1775_s26  ;;  %v1619_v33 = vpop.f32.mrb[13].mxu0 }
 0x519   : > { %v1220_v60 = vpop.f32.mrb[14].mxu0 }
 0x51a   : > { %1285 = vperm.xlu0 %1670, %v1722_v58   ;;  %v1620_v37 = vpop.f32.mrb[15].mxu0 }
 0x51c   : > { %1310 = vperm.xlu1 %1669, %v1724_v40  }
 0x51e   : > { %1228 = vrot.lane.b32.xlu0 %v1220_v60, %s1775_s26 }
 0x520   : > { %1340 = vperm.xlu1 %1669, %v1726_v42  }
 0x522   : > { %1315 = vperm.xlu0 %1670, %v1728_v63  }
 0x526   : > { %1345 = vperm.xlu0 %1670, %v1730_v0  }
 0x574   : > { %v829_v3 = vpop.permute.xlu1 %828 }
 0x575   : > { %v834_v28 = vadd.f32 %v829_v3, %v771_v47 }
 0x576   : > { %v831_v61 = vpop.permute.xlu0 %830 }
 0x577   : > { %837 = vst.msk [vmem:[#allocation4] sm:$0xff] %vm836_vm6, %v834_v28  ;;  %v835_v31 = vadd.f32 %v831_v61, %v772_v4 }
 0x579   : > { %838 = vst.msk [vmem:[#allocation4 + $0x8] sm:$0xff] %vm836_vm6, %v835_v31 }
 0x57e   : > { %v958_v59 = vld [vmem:[#allocation4] sm:$0xff] }
 0x57f   : > { %v970_v9 = vmul.f32 %v963_v29, %v958_v59 }
 0x580   : > { %v959_v44 = vld [vmem:[#allocation4 + $0x8] sm:$0xff] }
 0x585   : > { %v968_v32 = vpop.permute.xlu1 %967 }
 0x586   : > { %v971_v15 = vmul.f32 %v968_v32, %v959_v44 }
 0x587   : > { %v1167_v5 = vpop.permute.xlu0 %1166 }
 0x589   : > { %v1162_v8 = vpop.permute.xlu1 %1161 }
 0x58b   : > { %v1028_v39 = vpop.permute.xlu0 %1027 }
 0x58c   : > { %v1033_v43 = vadd.f32 %v1028_v39, %v970_v9 }
 0x58d   : > { %v1251_v10 = vpop.permute.xlu1 %1250 }
 0x58e   : > { %1036 = vst.msk [vmem:[#allocation4] sm:$0xff] %vm1035_vm7, %v1033_v43 }
 0x58f   : > { %v1030_v57 = vpop.permute.xlu0 %1029 }
 0x590   : > { %v1034_v25 = vadd.f32 %v1030_v57, %v971_v15 }
 0x591   : > { %v1281_v16 = vpop.permute.xlu1 %1280 }
 0x592   : > { %1037 = vst.msk [vmem:[#allocation4 + $0x8] sm:$0xff] %vm1035_vm7, %v1034_v25 }
 0x595   : > { %v1256_v45 = vpop.permute.xlu0 %1255  ;;  %v1157_v51 = vld [vmem:[#allocation4] sm:$0xff]  ;;  %v1227_v62 = vpop.permute.xlu1 %1226 }
 0x596   : > { %v1169_v53 = vmul.f32 %v1162_v8, %v1157_v51 }
 0x598   : > { %v1232_v17 = vadd.f32 %v1227_v62, %v1169_v53 }
 0x599   : > { %v1286_v2 = vpop.permute.xlu0 %1285  ;;  %v1158_v19 = vld [vmem:[#allocation4 + $0x8] sm:$0xff] }
 0x59a   : > { %1235 = vst.msk [vmem:[#allocation4] sm:$0xff] %vm1234_vm8, %v1232_v17  ;;  %v1170_v50 = vmul.f32 %v1167_v5, %v1158_v19 }
 0x59b   : > { %v1311_v7 = vpop.permute.xlu1 %1310 }
 0x59d   : > { %v1229_v54 = vpop.permute.xlu0 %1228 }
 0x59e   : > { %v1233_v55 = vadd.f32 %v1229_v54, %v1170_v50 }
 0x59f   : > { %v1341_v24 = vpop.permute.xlu1 %1340 }
 0x5a0   : > { %1236 = vst.msk [vmem:[#allocation4 + $0x8] sm:$0xff] %vm1234_vm8, %v1233_v55 }
 0x5a1   : > { %v1246_v11 = vld [vmem:[#allocation4] sm:$0xff]  ;;  %v1316_v26 = vpop.permute.xlu0 %1315 }
 0x5a2   : > { %v1258_v20 = vmul.f32 %v1251_v10, %v1246_v11  ;;  %v1288_v21 = vmul.f32 %v1281_v16, %v1246_v11  ;;  %v1318_v23 = vmul.f32 %v1311_v7, %v1246_v11  ;;  %v1348_v30 = vmul.f32 %v1341_v24, %v1246_v11 }
 0x5a4   : > { %v1549_v34 = vpack.c.bf16 %v1258_v20, %v1258_v20  ;;  %v1551_v13 = vpack.c.bf16 %v1288_v21, %v1288_v21  ;;  %v1553_v14 = vpack.c.bf16 %v1318_v23, %v1318_v23  ;;  %v1555_v18 = vpack.c.bf16 %v1348_v30, %v1348_v30 }
 0x5a5   : > { %v1346_v46 = vpop.permute.xlu0 %1345 }
 0x5a6   : > { %1269 = vst.msk [vmem:[%s413_s6] sm:$0xf] %vm1268_vm9, %v1549_v34 }
 0x5a7   : > { %1299 = vst.msk [vmem:[%s413_s6] sm:$0xf] %vm1298_vm10, %v1551_v13  ;;  %v1247_v36 = vld [vmem:[#allocation4 + $0x8] sm:$0xff] }
 0x5a8   : > { %1329 = vst.msk [vmem:[%s413_s6] sm:$0xf] %vm1328_vm11, %v1553_v14  ;;  %v1259_v22 = vmul.f32 %v1256_v45, %v1247_v36  ;;  %v1289_v38 = vmul.f32 %v1286_v2, %v1247_v36  ;;  %v1319_v41 = vmul.f32 %v1316_v26, %v1247_v36  ;;  %v1349_v49 = vmul.f32 %v1346_v46, %v1247_v36 }
 0x5a9   : > { %1359 = vst.msk [vmem:[%s413_s6] sm:$0xf] %vm1358_vm12, %v1555_v18 }
 0x5aa   : > { %v1550_v52 = vpack.c.bf16 %v1259_v22, %v1259_v22  ;;  %v1552_v56 = vpack.c.bf16 %v1289_v38, %v1289_v38  ;;  %v1554_v6 = vpack.c.bf16 %v1319_v41, %v1319_v41  ;;  %v1556_v12 = vpack.c.bf16 %v1349_v49, %v1349_v49 }
 0x5ac   : > { %1270 = vst.msk [vmem:[%s413_s6 + $0x4] sm:$0xf] %vm1268_vm9, %v1550_v52 }
 0x5ad   : > { %1300 = vst.msk [vmem:[%s413_s6 + $0x4] sm:$0xf] %vm1298_vm10, %v1552_v56 }
 0x5ae   : > { %1330 = vst.msk [vmem:[%s413_s6 + $0x4] sm:$0xf] %vm1328_vm11, %v1554_v6 }
 0x5af   : > { %1360 = vst.msk [vmem:[%s413_s6 + $0x4] sm:$0xf] %vm1358_vm12, %v1556_v12 }
 0x5b0 PF: > { %s13_s16 = sadd.s32 1, %s1769_s16   ;;  %s2203_s12 = smov %s1757_s13 }
 0x5b1   : > { %p10_p10 = scmp.ge.s32.totalorder %s13_s16, 4   ;;  %s2204_s13 = smov %s1837_s21 }
 0x5b2   : > { %s2205_s14 = smov %s1765_s15  ;;  %s2206_s15 = smov %s2208_s17 }
 0x5b3   :  { %12 = sbr.rel (!%p10_p10) target bundleno = 3 (0x3), region = 227 }

// kernel: transformer_lm.17
= control target key start
LH: loop header
LB: loop body
LE: loop exit
PB: predicated region body
PF: predicated region fallthrough
CT: control target
= control target key end

     0   :  { %s455_s0 = inlined_call_operand.vmem [shape: f32[32,128], index: 0, kind: input, shape index: {}]   ;;  %s456_s1 = inlined_call_operand.vmem [shape: f32[1,128], index: 1, kind: input, shape index: {}]   ;;  %s457_s2 = inlined_call_operand.vmem [shape: bf16[128,256], index: 2, kind: input, shape index: {}]   ;;  %s458_s3 = inlined_call_operand.hbm [shape: f32[32,256], index: 3, kind: output, shape index: {}]  }
   0x1   :  { %v363_v0 = vld [vmem:[%s455_s0 + $0x10] sm:$0xff]  ;;  %v368_v1 = vld [vmem:[%s455_s0] sm:$0xff]  ;;  %v373_v2 = vld [vmem:[%s455_s0 + $0x18] sm:$0xff] }
   0x2   :  { %v26_v3 = vmul.f32 %v363_v0, %v363_v0  ;;  %v24_v4 = vmul.f32 %v368_v1, %v368_v1  ;;  %v382_v5 = vld [vmem:[%s455_s0 + $0x8] sm:$0xff]  ;;  %v27_v8 = vmul.f32 %v373_v2, %v373_v2  ;;  %v283_v10 = vld [vmem:[%s457_s2 + $0x14] ss:$8 sps:$4 sm:$0xff]   ;;  %v285_v11 = vld [vmem:[%s457_s2 + $0x10] ss:$8 sps:$4 sm:$0xff]  }
   0x3   :  { %v280_v6 = vld [vmem:[%s457_s2 + $0x4] ss:$8 sps:$4 sm:$0xff]   ;;  %v282_v7 = vld [vmem:[%s457_s2] ss:$8 sps:$4 sm:$0xff]   ;;  %v25_v9 = vmul.f32 %v382_v5, %v382_v5 }
   0x4   :  { %32 = vadd.xlane.f32.xlu1 %v26_v3  ;;  %28 = vadd.xlane.f32.xlu0 %v24_v4 }
   0x5   :  { %166 = vmatprep.subr.bf16.mxu0 %v280_v6  ;;  %260 = vmatprep.subr.bf16.mxu1 %v280_v6 }
   0x6   :  { %167 = vmatpush1.bf16.msra.mxu0 %v282_v7  ;;  %268 = vmatpush1.bf16.msra.mxu1 %v282_v7 }
   0x7   :  { %168 = vmatprep.subr.bf16.mxu0 %v283_v10  ;;  %261 = vmatprep.subr.bf16.mxu1 %v283_v10 }
   0x8   :  { %34 = vadd.xlane.f32.xlu1 %v27_v8  ;;  %30 = vadd.xlane.f32.xlu0 %v25_v9 }
   0x9   :  { %8 = vsyncpa [#allocation4], 0  ;;  %v286_v12 = vld [vmem:[%s457_s2 + $0x24] ss:$8 sps:$4 sm:$0xff]   ;;  %v288_v13 = vld [vmem:[%s457_s2 + $0x20] ss:$8 sps:$4 sm:$0xff]  }
   0xa   :  { %169 = vmatpush1.bf16.msra.mxu0 %v285_v11  ;;  %269 = vmatpush1.bf16.msra.mxu1 %v285_v11  ;;  %v289_v14 = vld [vmem:[%s457_s2 + $0x34] ss:$8 sps:$4 sm:$0xff]   ;;  %v291_v15 = vld [vmem:[%s457_s2 + $0x30] ss:$8 sps:$4 sm:$0xff]   ;;  %v292_v16 = vld [vmem:[%s457_s2 + $0x44] ss:$8 sps:$4 sm:$0xff]  }
   0xb   :  { %170 = vmatprep.subr.bf16.mxu0 %v286_v12  ;;  %262 = vmatprep.subr.bf16.mxu1 %v286_v12  ;;  %v294_v17 = vld [vmem:[%s457_s2 + $0x40] ss:$8 sps:$4 sm:$0xff]   ;;  %v295_v18 = vld [vmem:[%s457_s2 + $0x54] ss:$8 sps:$4 sm:$0xff]   ;;  %v297_v19 = vld [vmem:[%s457_s2 + $0x50] ss:$8 sps:$4 sm:$0xff]  }
   0xc   :  { %v298_v20 = vld [vmem:[%s457_s2 + $0x64] ss:$8 sps:$4 sm:$0xff]   ;;  %v336_v21 = vmov 0   ;;  %v300_v22 = vld [vmem:[%s457_s2 + $0x60] ss:$8 sps:$4 sm:$0xff]   ;;  %s337_s25 = smov [#allocation3]  }
   0xd   :  { %198 = vmatprep.mubr.bf16.mxu0 %v336_v21  ;;  %208 = vmatprep.mubr.bf16.mxu1 %v336_v21  ;;  %v301_v23 = vld [vmem:[%s457_s2 + $0x74] ss:$8 sps:$4 sm:$0xff]   ;;  %v303_v24 = vld [vmem:[%s457_s2 + $0x70] ss:$8 sps:$4 sm:$0xff]   ;;  %v243_v42 = vld [vmem:[%s456_s1] ss:$0 sm:$0xff] }
   0xe   :  { %171 = vmatpush1.bf16.msra.mxu0 %v288_v13  ;;  %270 = vmatpush1.bf16.msra.mxu1 %v288_v13  ;;  %s232_s0 = sshll.u32 %s337_s25, 4  ;;  %s233_s0 = int_to_ptr.vmem [resolvable:$true] %s232_s0 }
   0xf   :  { %172 = vmatprep.subr.bf16.mxu0 %v289_v14  ;;  %263 = vmatprep.subr.bf16.mxu1 %v289_v14  ;;  %s312_s1 = scalar_lea.vmem %s233_s0, 1024  ;;  %p317_p1 = scmp.lt.s32.totalorder %s233_s0, %s233_s0 }
  0x10   :  { %p313_p0 = scmp.ne.s32.totalorder %s233_s0, %s312_s1  ;;  %p318_p2 = scmp.lt.s32.totalorder %s312_s1, %s312_s1 }
  0x12   :  { %173 = vmatpush1.bf16.msra.mxu0 %v291_v15  ;;  %271 = vmatpush1.bf16.msra.mxu1 %v291_v15  ;;  %p319_p3 = por %p318_p2, %p317_p1 }
  0x13   :  { %174 = vmatprep.subr.bf16.mxu0 %v292_v16  ;;  %264 = vmatprep.subr.bf16.mxu1 %v292_v16 }
  0x14   :  { %p320_p4 = pnand %p319_p3, %p313_p0 }
  0x16   :  { %175 = vmatpush1.bf16.msra.mxu0 %v294_v17  ;;  %272 = vmatpush1.bf16.msra.mxu1 %v294_v17 }
  0x17   :  { %176 = vmatprep.subr.bf16.mxu0 %v295_v18  ;;  %265 = vmatprep.subr.bf16.mxu1 %v295_v18 }
  0x1a   :  { %177 = vmatpush1.bf16.msra.mxu0 %v297_v19  ;;  %273 = vmatpush1.bf16.msra.mxu1 %v297_v19 }
  0x1b   :  { %178 = vmatprep.subr.bf16.mxu0 %v298_v20  ;;  %266 = vmatprep.subr.bf16.mxu1 %v298_v20 }
  0x1e   :  { %179 = vmatpush1.bf16.msra.mxu0 %v300_v22  ;;  %274 = vmatpush1.bf16.msra.mxu1 %v300_v22 }
  0x1f   :  { %180 = vmatprep.subr.bf16.mxu0 %v301_v23  ;;  %267 = vmatprep.subr.bf16.mxu1 %v301_v23 }
  0x22   :  { %181 = vmatpush1.bf16.msra.mxu0 %v303_v24  ;;  %275 = vmatpush1.bf16.msra.mxu1 %v303_v24 }
  0x91   :  { %v33_v25 = vpop.xlane.xlu1 %32  ;;  %v29_v26 = vpop.xlane.xlu0 %28 }
  0x92   :  { %v39_v27 = vmul.f32 0.0078125, %v33_v25  ;;  %v37_v28 = vmul.f32 0.0078125, %v29_v26 }
  0x94   :  { %v43_v29 = vadd.f32 1e-05, %v39_v27  ;;  %v41_v30 = vadd.f32 1e-05, %v37_v28 }
  0x95   :  { %v35_v31 = vpop.xlane.xlu1 %34  ;;  %v31_v32 = vpop.xlane.xlu0 %30 }
  0x96   :  { %304 = vrsqrt.f32 %v43_v29  ;;  %v40_v33 = vmul.f32 0.0078125, %v35_v31  ;;  %v38_v34 = vmul.f32 0.0078125, %v31_v32 }
  0x97   :  { %306 = vrsqrt.f32 %v41_v30 }
  0x98   :  { %v44_v35 = vadd.f32 1e-05, %v40_v33  ;;  %v42_v36 = vadd.f32 1e-05, %v38_v34 }
  0x9a   :  { %308 = vrsqrt.f32 %v44_v35 }
  0x9b   :  { %310 = vrsqrt.f32 %v42_v36 }
  0xa0   :  { %v305_v37 = vpop.eup %304 }
  0xa1   :  { %v307_v38 = vpop.eup %306  ;;  %v51_v39 = vmul.f32 %v305_v37, %v363_v0 }
  0xa2   :  { %v49_v41 = vmul.f32 %v307_v38, %v368_v1 }
  0xa3   :  { %v62_v46 = vmul.f32 %v243_v42, %v51_v39 }
  0xa4   :  { %v309_v40 = vpop.eup %308  ;;  %v60_v48 = vmul.f32 %v243_v42, %v49_v41 }
  0xa5   :  { %v311_v43 = vpop.eup %310  ;;  %v52_v44 = vmul.f32 %v309_v40, %v373_v2 }
  0xa6   :  { %v50_v45 = vmul.f32 %v311_v43, %v382_v5 }
  0xa7   :  { %v63_v47 = vmul.f32 %v243_v42, %v52_v44 }
  0xa8   :  { %v61_v49 = vmul.f32 %v243_v42, %v50_v45 }
  0xa9   :  { %v65_v50 = vpack.c.bf16 %v63_v47, %v62_v46 }
  0xaa   :  { %v64_v51 = vpack.c.bf16 %v61_v49, %v60_v48 }
  0xab   :  { %209 = vmatmul.mubr.bf16.vlgmr.msra.gmra.mrb[0].mxu1 %v65_v50 }
  0xac   :  { %199 = vmatmul.mubr.bf16.vlgmr.msra.gmra.mrb[0].mxu0 %v64_v51 }
 0x17e   :  { %v210_v52 = vpop.f32.mrb[0].mxu1 }
 0x17f   :  { %v200_v53 = vpop.f32.mrb[0].mxu0  ;;  %223 = vst [vmem:[#allocation3 + $0x20] sm:$0xff] %v210_v52  ;;  %v212_v54 = vpop.f32.mrb[1].mxu1 }
 0x180   :  { %219 = vst [vmem:[#allocation3] sm:$0xff] %v200_v53  ;;  %v202_v55 = vpop.f32.mrb[1].mxu0  ;;  %224 = vst [vmem:[#allocation3 + $0x28] sm:$0xff] %v212_v54  ;;  %v214_v56 = vpop.f32.mrb[2].mxu1 }
 0x181   :  { %220 = vst [vmem:[#allocation3 + $0x8] sm:$0xff] %v202_v55  ;;  %v204_v57 = vpop.f32.mrb[2].mxu0  ;;  %225 = vst [vmem:[#allocation3 + $0x30] sm:$0xff] %v214_v56  ;;  %v216_v58 = vpop.f32.mrb[3].mxu1 }
 0x182   :  { %221 = vst [vmem:[#allocation3 + $0x10] sm:$0xff] %v204_v57  ;;  %v206_v59 = vpop.f32.mrb[3].mxu0  ;;  %226 = vst [vmem:[#allocation3 + $0x38] sm:$0xff] %v216_v58 }
 0x183   :  { %222 = vst [vmem:[#allocation3 + $0x18] sm:$0xff] %v206_v59 }
 0x184   :  { %323 = shalt.err (!%p320_p4)
}
 0x185   :  { %s324_s28 = scalar_lea.hbm %s458_s3, 1024 }
 0x186   :  { %p325_p5 = scmp.ne.s32.totalorder %s458_s3, %s324_s28  ;;  %p328_p6 = scmp.lt.u32.totalorder %s324_s28, %s458_s3 }
 0x188   :  { %p330_p7 = pnand %p328_p6, %p325_p5 }
 0x18a   :  { %333 = shalt.err (!%p330_p7)
}
 0x18b   :  { %s338_s6 = smov 256   ;;  %s339_s7 = smov 16  }
 0x18c   :  { %238 = dma.vmem_to_hbm [thread:$0]  %s233_s0, 1024, %s458_s3, [#allocation4], %s338_s6, %s338_s6, %s339_s7  }
 0x18d   :  { %334 = dma.done.wait [#allocation4], 1024  }
 0x18e   :  { %335 = vsyncadd [#allocation4], 4294966272 }
 0x18f   :  { %242 = vsyncpa [#allocation4], 1 }

</bundles_post_ra>
